<compile_context>
chip_gen: v7x
topology: tpu7x:2x2x1
jax: 0.10.0
libtpu: 0.0.40
codegen_flags: <defaults>
</compile_context>

<pallas_src>
import functools

import numpy as np

import jax
import jax.numpy as jnp
from jax.experimental import pallas as pl
from jax.experimental.pallas import tpu as pltpu

PATCH = 16                    # ViT patch size
EMB_C = 32                    # embedding channels (stand-in for SAM's 256)
UP = 4                        # mask-decoder upscale per embedding position
INPUT_SIZE = (800, 1024)
ORIGINAL_SIZE = (200, 256)
OUT_H, OUT_W = ORIGINAL_SIZE


# ----------------------------- Pallas kernel ------------------------------- #

def _fused_sam_kernel(patch_ref, w_ref, aw_ref, ah_ref, bias_ref, out_ref,
                      s_ref, *, gh, jt):
    """Fused patch-embed + mask-decode + double-bilinear-resize + sigmoid.

    patch_ref: (jt, gh, D) bf16   jt patch-grid columns of one image
    w_ref:     (D, 16)     bf16   pre-composed  w_enc @ w_up
    aw_ref:    (jt*4, 256) bf16   Aw rows for this column group
    ah_ref:    (200, 4*gh) bf16   Ah with columns grouped by upsample offset u
    bias_ref:  (200, 256)  f32    folded prompt-encoder bias (pre-sigmoid)
    out_ref:   (200, 256)  f32    sigmoid masks for this image
    s_ref:     (4, gh, 256) f32   scratch accumulator for  S = low_res @ Aw,
                                  rows ordered (u, gh_i)
    """
    j = pl.program_id(1)
    nj = pl.num_programs(1)

    @pl.when(j == 0)
    def _init():
        s_ref[...] = jnp.zeros_like(s_ref)

    # Per-step partial accumulation of S = low_res @ Aw.
    acc = [jnp.zeros((gh, OUT_W), jnp.float32) for _ in range(UP)]
    for j_loc in range(jt):                                  # static unroll
        # patch embed + decoder up-projection for one patch-grid column
        dec = jnp.dot(patch_ref[j_loc], w_ref[...],
                      preferred_element_type=jnp.float32)    # (gh, 16)
        dec = dec.astype(jnp.bfloat16)
        aw_blk = aw_ref[j_loc * UP:(j_loc + 1) * UP, :]      # (4, 256)
        for u in range(UP):                                  # static unroll
            acc[u] = acc[u] + jnp.dot(dec[:, u * UP:(u + 1) * UP], aw_blk,
                                      preferred_element_type=jnp.float32)
    for u in range(UP):
        s_ref[u] = s_ref[u] + acc[u]

    @pl.when(j == nj - 1)
    def _finalize():
        z = bias_ref[...]                                    # (200, 256) f32
        for u in range(UP):                                  # Ah @ (low_res @ Aw)
            z = z + jnp.dot(ah_ref[:, u * gh:(u + 1) * gh],
                            s_ref[u].astype(jnp.bfloat16),
                            preferred_element_type=jnp.float32)
        out_ref[...] = jax.nn.sigmoid(z)


# ------------------------------- host / init ------------------------------- #

def _bilinear_matrix(out_size, in_size):
    """NumPy row-stochastic matrix reproducing F.interpolate(mode='bilinear',
    align_corners=False) along one axis: out = A @ in."""
    i = np.arange(out_size, dtype=np.float64)
    scale = in_size / out_size
    src = np.clip((i + 0.5) * scale - 0.5, 0.0, in_size - 1)
    i0 = np.floor(src).astype(np.int64)
    frac = src - i0
    i1 = np.minimum(i0 + 1, in_size - 1)
    a = np.zeros((out_size, in_size), np.float64)
    rows = np.arange(out_size)
    np.add.at(a, (rows, i0), 1.0 - frac)
    np.add.at(a, (rows, i1), frac)
    return a


def init_params(key, image_shape):
    B, C_in, H, W = image_shape
    gh, gw = H // PATCH, W // PATCH
    P, D = gh * gw, C_in * PATCH * PATCH
    k1, k2, k3, k4 = jax.random.split(key, 4)
    return {
        "w_enc": 0.02 * jax.random.normal(k1, (D, EMB_C), jnp.float32),
        "dense_pe": 0.02 * jax.random.normal(k2, (P, EMB_C), jnp.float32),
        "no_mask_embed": 0.02 * jax.random.normal(k3, (EMB_C,), jnp.float32),
        "w_up": 0.02 * jax.random.normal(k4, (EMB_C, UP * UP), jnp.float32),
    }


def fold_params(params, image_shape):
    """One-time NumPy weight folding (inference-time constant folding)."""
    _, C_in, H, W = image_shape
    gh, gw = H // PATCH, W // PATCH
    h_lr, w_lr = gh * UP, gw * UP

    w_enc = np.asarray(params["w_enc"], np.float64)
    w_up = np.asarray(params["w_up"], np.float64)
    dense_pe = np.asarray(params["dense_pe"], np.float64)
    no_mask = np.asarray(params["no_mask_embed"], np.float64)

    # encoder + decoder collapse: dec = patches @ w_comb  (+ static bias below)
    w_comb = w_enc @ w_up                                        # (D, 16)
    bias_up = (dense_pe + no_mask[None, :]) @ w_up               # (P, 16)
    bias_lr = (bias_up.reshape(gh, gw, UP, UP)
                       .transpose(0, 2, 1, 3)
                       .reshape(h_lr, w_lr))                     # low-res bias

    # F.interpolate(H,W) -> crop[:800,:1024] -> F.interpolate(200,256), composed.
    crop_h, crop_w = min(H, INPUT_SIZE[0]), min(W, INPUT_SIZE[1])
    ah1 = _bilinear_matrix(H, h_lr)[:crop_h]                     # (crop_h, h_lr)
    aw1 = _bilinear_matrix(W, w_lr)[:crop_w]                     # (crop_w, w_lr)
    ah2 = _bilinear_matrix(OUT_H, crop_h)                        # (200, crop_h)
    aw2 = _bilinear_matrix(OUT_W, crop_w)                        # (256, crop_w)
    ah = ah2 @ ah1                                               # (200, h_lr)
    aw = (aw2 @ aw1).T                                           # (w_lr, 256)

    bias_z = ah @ bias_lr @ aw                                   # (200, 256) static

    # Group Ah's columns by upsample offset u so the kernel reads the contiguous
    # slice ah[:, u*gh:(u+1)*gh] == Ah[:, gh_i*UP + u] for gh_i = 0..gh-1.
    perm = np.arange(h_lr).reshape(gh, UP).T.reshape(-1)
    ah_grouped = ah[:, perm]

    return {
        "w_comb": jnp.asarray(w_comb, jnp.bfloat16),
        "ah": jnp.asarray(ah_grouped, jnp.bfloat16),
        "aw": jnp.asarray(aw, jnp.bfloat16),
        "bias_z": jnp.asarray(bias_z, jnp.float32),
    }


@jax.jit
def sam_forward(image, folded):
    B, C_in, H, W = image.shape
    gh, gw = H // PATCH, W // PATCH
    D = C_in * PATCH * PATCH
    h_lr, w_lr = gh * UP, gw * UP
    assert folded["ah"].shape == (OUT_H, h_lr)
    assert folded["aw"].shape == (w_lr, OUT_W)

    # ViT non-overlapping patch extraction, laid out as (B, gw, gh, D) so the
    # kernel's grid axis over patch-grid columns maps to contiguous HBM blocks.
    # bf16 halves the kernel's HBM read bytes.
    patches = (image.reshape(B, C_in, gh, PATCH, gw, PATCH)
                    .transpose(0, 4, 2, 1, 3, 5)
                    .reshape(B, gw, gh, D)
                    .astype(jnp.bfloat16))

    # Largest column group whose double-buffered block stays around a few MiB.
    jt = 1
    for cand in range(gw, 0, -1):
        if gw % cand:
            continue
        if cand * gh * D * 2 > 4 * 1024 * 1024:
            continue
        if cand != gw and (cand * UP) % 8:
            continue
        jt = cand
        break

    kernel = functools.partial(_fused_sam_kernel, gh=gh, jt=jt)

    masks = pl.pallas_call(
        kernel,
        out_shape=jax.ShapeDtypeStruct((B, OUT_H, OUT_W), jnp.float32),
        grid_spec=pltpu.PrefetchScalarGridSpec(
            num_scalar_prefetch=0,
            grid=(B, gw // jt),
            in_specs=[
                pl.BlockSpec((None, jt, gh, D), lambda b, j: (b, j, 0, 0)),
                pl.BlockSpec((D, UP * UP), lambda b, j: (0, 0)),
                pl.BlockSpec((jt * UP, OUT_W), lambda b, j: (j, 0)),
                pl.BlockSpec((OUT_H, h_lr), lambda b, j: (0, 0)),
                pl.BlockSpec((OUT_H, OUT_W), lambda b, j: (0, 0)),
            ],
            out_specs=pl.BlockSpec((None, OUT_H, OUT_W), lambda b, j: (b, 0, 0)),
            scratch_shapes=[pltpu.VMEM((UP, gh, OUT_W), jnp.float32)],
        ),
        compiler_params=pltpu.CompilerParams(
            dimension_semantics=("parallel", "arbitrary"),
            allow_input_fusion=[True, False, False, False, False],
            vmem_limit_bytes=32 * 1024 * 1024,
        ),
    )(patches, folded["w_comb"], folded["aw"], folded["ah"], folded["bias_z"])

    return masks[:, None, :, :]                                  # (B, 1, 200, 256)


# ----------------------------- pure-NumPy reference ------------------------ #

def reference_forward(image, params):
    """Unfused f64 reference of the stand-in pipeline (validates all folding)."""
    img = np.asarray(image, np.float64)
    B, C_in, H, W = img.shape
    gh, gw = H // PATCH, W // PATCH
    P, D = gh * gw, C_in * PATCH * PATCH
    h_lr, w_lr = gh * UP, gw * UP

    w_enc = np.asarray(params["w_enc"], np.float64)
    w_up = np.asarray(params["w_up"], np.float64)
    dense_pe = np.asarray(params["dense_pe"], np.float64)
    no_mask = np.asarray(params["no_mask_embed"], np.float64)

    patches = (img.reshape(B, C_in, gh, PATCH, gw, PATCH)
                  .transpose(0, 2, 4, 1, 3, 5)
                  .reshape(B, P, D))
    emb = patches @ w_enc                                   # image encoder stand-in
    dec = (emb + dense_pe + no_mask) @ w_up                 # mask decoder stand-in
    low_res = (dec.reshape(B, gh, gw, UP, UP)
                  .transpose(0, 1, 3, 2, 4)
                  .reshape(B, h_lr, w_lr))

    crop_h, crop_w = min(H, INPUT_SIZE[0]), min(W, INPUT_SIZE[1])
    ah = _bilinear_matrix(OUT_H, crop_h) @ _bilinear_matrix(H, h_lr)[:crop_h]
    aw = (_bilinear_matrix(OUT_W, crop_w) @ _bilinear_matrix(W, w_lr)[:crop_w]).T
    z = np.einsum("rh,bhw,wc->brc", ah, low_res, aw)
    return 1.0 / (1.0 + np.exp(-z))                         # (B, 200, 256)


if __name__ == "__main__":
    key = jax.random.PRNGKey(0)
    k_img, k_par = jax.random.split(key)

    image = jax.random.normal(k_img, (2, 3, 64, 64), jnp.float32)  # small NCHW input
    params = init_params(k_par, image.shape)
    folded = fold_params(params, image.shape)

    out = jax.block_until_ready(sam_forward(image, folded))

    assert out.shape == (2, 1, OUT_H, OUT_W), out.shape
    assert out.dtype == jnp.float32
    out_np = np.asarray(out)
    assert np.all(np.isfinite(out_np))
    assert np.all((out_np >= 0.0) & (out_np <= 1.0))           # sigmoid range

    ref = reference_forward(image, params)
    err = float(np.max(np.abs(out_np[:, 0] - ref)))
    assert err < 5e-3, f"max abs error vs f64 reference: {err}"

    print("KERNEL_OK")
</pallas_src>

<mosaic_0001>
module attributes {stable_mosaic.version = 11 : i64} {
  func.func @_fused_sam_kernel(%arg0: i32, %arg1: i32, %arg2: memref<1x4x4x768xbf16, #tpu.memory_space<vmem>>, %arg3: memref<768x16xbf16, #tpu.memory_space<vmem>>, %arg4: memref<16x256xbf16, #tpu.memory_space<vmem>>, %arg5: memref<200x16xbf16, #tpu.memory_space<vmem>>, %arg6: memref<200x256xf32, #tpu.memory_space<vmem>>, %arg7: memref<1x200x256xf32, #tpu.memory_space<vmem>>, %arg8: memref<4x4x256xf32, #tpu.memory_space<vmem>>) attributes {dimension_semantics = [#tpu.dimension_semantics<parallel>, #tpu.dimension_semantics<arbitrary>], iteration_bounds = array<i64: 2, 1>, scalar_prefetch = 0 : i64, scratch_operands = 1 : i64, tpu.core_type = #tpu.core_type<tc>, window_params = [{transform_indices = @transform_0, window_bounds = array<i64: 1, 4, 4, 768>}, {pipeline_mode = #tpu.pipeline_mode<synchronous>, transform_indices = @transform_1, window_bounds = array<i64: 768, 16>}, {transform_indices = @transform_2, window_bounds = array<i64: 16, 256>}, {pipeline_mode = #tpu.pipeline_mode<synchronous>, transform_indices = @transform_3, window_bounds = array<i64: 200, 16>}, {pipeline_mode = #tpu.pipeline_mode<synchronous>, transform_indices = @transform_4, window_bounds = array<i64: 200, 256>}, {transform_indices = @transform_5, window_bounds = array<i64: 1, 200, 256>}]} {
    %c0_i32 = arith.constant 0 : i32
    %0 = arith.cmpi eq, %arg1, %c0_i32 : i32
    %1 = arith.extui %0 : i1 to i32
    %c0_i32_0 = arith.constant 0 : i32
    %2 = arith.cmpi ne, %1, %c0_i32_0 : i32
    scf.if %2 {
      %cst_75 = arith.constant 0.000000e+00 : f32
      %106 = vector.broadcast %cst_75 : f32 to vector<4x4x256xf32>
      %c0_76 = arith.constant 0 : index
      %c0_77 = arith.constant 0 : index
      %c0_78 = arith.constant 0 : index
      %107 = vector.load %arg8[%c0_76, %c0_77, %c0_78] : memref<4x4x256xf32, #tpu.memory_space<vmem>>, vector<4x4x256xf32>
      tpu.vector_store %arg8[%c0_76, %c0_77, %c0_78], %106 {strides = array<i32>} : memref<4x4x256xf32, #tpu.memory_space<vmem>>, vector<4x4x256xf32>,
    } else {
    }
    %cst = arith.constant 0.000000e+00 : f32
    %3 = vector.broadcast %cst : f32 to vector<4x256xf32>
    %cst_1 = arith.constant 0.000000e+00 : f32
    %4 = vector.broadcast %cst_1 : f32 to vector<4x256xf32>
    %cst_2 = arith.constant 0.000000e+00 : f32
    %5 = vector.broadcast %cst_2 : f32 to vector<4x256xf32>
    %cst_3 = arith.constant 0.000000e+00 : f32
    %6 = vector.broadcast %cst_3 : f32 to vector<4x256xf32>
    %c0 = arith.constant 0 : index
    %c0_4 = arith.constant 0 : index
    %c0_5 = arith.constant 0 : index
    %c0_6 = arith.constant 0 : index
    %7 = vector.load %arg2[%c0, %c0_4, %c0_5, %c0_6] : memref<1x4x4x768xbf16, #tpu.memory_space<vmem>>, vector<1x1x4x768xbf16>
    %8 = vector.shape_cast %7 : vector<1x1x4x768xbf16> to vector<4x768xbf16>
    %c0_7 = arith.constant 0 : index
    %c0_8 = arith.constant 0 : index
    %9 = vector.load %arg3[%c0_7, %c0_8] : memref<768x16xbf16, #tpu.memory_space<vmem>>, vector<768x16xbf16>
    %cst_9 = arith.constant dense<0.000000e+00> : vector<4x16xf32>
    %10 = tpu.matmul %8, %9, %cst_9 {dimension_numbers = #tpu.dot_dimension_numbers<[1], [0], [0], [1], [0, 0, 1, 1], [], []>} : vector<4x768xbf16>, vector<768x16xbf16>, vector<4x16xf32> -> vector<4x16xf32>
    %11 = arith.truncf %10 : vector<4x16xf32> to vector<4x16xbf16>
    %c0_10 = arith.constant 0 : index
    %c0_11 = arith.constant 0 : index
    %12 = vector.load %arg4[%c0_10, %c0_11] : memref<16x256xbf16, #tpu.memory_space<vmem>>, vector<4x256xbf16>
    %13 = vector.extract_strided_slice %11 {offsets = [0, 0], sizes = [4, 4], strides = [1, 1]} : vector<4x16xbf16> to vector<4x4xbf16>
    %cst_12 = arith.constant dense<0.000000e+00> : vector<4x256xf32>
    %14 = tpu.matmul %13, %12, %cst_12 {dimension_numbers = #tpu.dot_dimension_numbers<[1], [0], [0], [1], [0, 0, 1, 1], [], []>} : vector<4x4xbf16>, vector<4x256xbf16>, vector<4x256xf32> -> vector<4x256xf32>
    %15 = arith.addf %3, %14 : vector<4x256xf32>
    %16 = vector.extract_strided_slice %11 {offsets = [0, 4], sizes = [4, 4], strides = [1, 1]} : vector<4x16xbf16> to vector<4x4xbf16>
    %cst_13 = arith.constant dense<0.000000e+00> : vector<4x256xf32>
    %17 = tpu.matmul %16, %12, %cst_13 {dimension_numbers = #tpu.dot_dimension_numbers<[1], [0], [0], [1], [0, 0, 1, 1], [], []>} : vector<4x4xbf16>, vector<4x256xbf16>, vector<4x256xf32> -> vector<4x256xf32>
    %18 = arith.addf %4, %17 : vector<4x256xf32>
    %19 = vector.extract_strided_slice %11 {offsets = [0, 8], sizes = [4, 4], strides = [1, 1]} : vector<4x16xbf16> to vector<4x4xbf16>
    %cst_14 = arith.constant dense<0.000000e+00> : vector<4x256xf32>
    %20 = tpu.matmul %19, %12, %cst_14 {dimension_numbers = #tpu.dot_dimension_numbers<[1], [0], [0], [1], [0, 0, 1, 1], [], []>} : vector<4x4xbf16>, vector<4x256xbf16>, vector<4x256xf32> -> vector<4x256xf32>
    %21 = arith.addf %5, %20 : vector<4x256xf32>
    %22 = vector.extract_strided_slice %11 {offsets = [0, 12], sizes = [4, 4], strides = [1, 1]} : vector<4x16xbf16> to vector<4x4xbf16>
    %cst_15 = arith.constant dense<0.000000e+00> : vector<4x256xf32>
    %23 = tpu.matmul %22, %12, %cst_15 {dimension_numbers = #tpu.dot_dimension_numbers<[1], [0], [0], [1], [0, 0, 1, 1], [], []>} : vector<4x4xbf16>, vector<4x256xbf16>, vector<4x256xf32> -> vector<4x256xf32>
    %24 = arith.addf %6, %23 : vector<4x256xf32>
    %c0_16 = arith.constant 0 : index
    %c1 = arith.constant 1 : index
    %c0_17 = arith.constant 0 : index
    %c0_18 = arith.constant 0 : index
    %25 = vector.load %arg2[%c0_16, %c1, %c0_17, %c0_18] : memref<1x4x4x768xbf16, #tpu.memory_space<vmem>>, vector<1x1x4x768xbf16>
    %26 = vector.shape_cast %25 : vector<1x1x4x768xbf16> to vector<4x768xbf16>
    %c0_19 = arith.constant 0 : index
    %c0_20 = arith.constant 0 : index
    %27 = vector.load %arg3[%c0_19, %c0_20] : memref<768x16xbf16, #tpu.memory_space<vmem>>, vector<768x16xbf16>
    %cst_21 = arith.constant dense<0.000000e+00> : vector<4x16xf32>
    %28 = tpu.matmul %26, %27, %cst_21 {dimension_numbers = #tpu.dot_dimension_numbers<[1], [0], [0], [1], [0, 0, 1, 1], [], []>} : vector<4x768xbf16>, vector<768x16xbf16>, vector<4x16xf32> -> vector<4x16xf32>
    %29 = arith.truncf %28 : vector<4x16xf32> to vector<4x16xbf16>
    %c4 = arith.constant 4 : index
    %c0_22 = arith.constant 0 : index
    %30 = vector.load %arg4[%c4, %c0_22] : memref<16x256xbf16, #tpu.memory_space<vmem>>, vector<4x256xbf16>
    %31 = vector.extract_strided_slice %29 {offsets = [0, 0], sizes = [4, 4], strides = [1, 1]} : vector<4x16xbf16> to vector<4x4xbf16>
    %cst_23 = arith.constant dense<0.000000e+00> : vector<4x256xf32>
    %32 = tpu.matmul %31, %30, %cst_23 {dimension_numbers = #tpu.dot_dimension_numbers<[1], [0], [0], [1], [0, 0, 1, 1], [], []>} : vector<4x4xbf16>, vector<4x256xbf16>, vector<4x256xf32> -> vector<4x256xf32>
    %33 = arith.addf %15, %32 : vector<4x256xf32>
    %34 = vector.extract_strided_slice %29 {offsets = [0, 4], sizes = [4, 4], strides = [1, 1]} : vector<4x16xbf16> to vector<4x4xbf16>
    %cst_24 = arith.constant dense<0.000000e+00> : vector<4x256xf32>
    %35 = tpu.matmul %34, %30, %cst_24 {dimension_numbers = #tpu.dot_dimension_numbers<[1], [0], [0], [1], [0, 0, 1, 1], [], []>} : vector<4x4xbf16>, vector<4x256xbf16>, vector<4x256xf32> -> vector<4x256xf32>
    %36 = arith.addf %18, %35 : vector<4x256xf32>
    %37 = vector.extract_strided_slice %29 {offsets = [0, 8], sizes = [4, 4], strides = [1, 1]} : vector<4x16xbf16> to vector<4x4xbf16>
    %cst_25 = arith.constant dense<0.000000e+00> : vector<4x256xf32>
    %38 = tpu.matmul %37, %30, %cst_25 {dimension_numbers = #tpu.dot_dimension_numbers<[1], [0], [0], [1], [0, 0, 1, 1], [], []>} : vector<4x4xbf16>, vector<4x256xbf16>, vector<4x256xf32> -> vector<4x256xf32>
    %39 = arith.addf %21, %38 : vector<4x256xf32>
    %40 = vector.extract_strided_slice %29 {offsets = [0, 12], sizes = [4, 4], strides = [1, 1]} : vector<4x16xbf16> to vector<4x4xbf16>
    %cst_26 = arith.constant dense<0.000000e+00> : vector<4x256xf32>
    %41 = tpu.matmul %40, %30, %cst_26 {dimension_numbers = #tpu.dot_dimension_numbers<[1], [0], [0], [1], [0, 0, 1, 1], [], []>} : vector<4x4xbf16>, vector<4x256xbf16>, vector<4x256xf32> -> vector<4x256xf32>
    %42 = arith.addf %24, %41 : vector<4x256xf32>
    %c0_27 = arith.constant 0 : index
    %c2 = arith.constant 2 : index
    %c0_28 = arith.constant 0 : index
    %c0_29 = arith.constant 0 : index
    %43 = vector.load %arg2[%c0_27, %c2, %c0_28, %c0_29] : memref<1x4x4x768xbf16, #tpu.memory_space<vmem>>, vector<1x1x4x768xbf16>
    %44 = vector.shape_cast %43 : vector<1x1x4x768xbf16> to vector<4x768xbf16>
    %c0_30 = arith.constant 0 : index
    %c0_31 = arith.constant 0 : index
    %45 = vector.load %arg3[%c0_30, %c0_31] : memref<768x16xbf16, #tpu.memory_space<vmem>>, vector<768x16xbf16>
    %cst_32 = arith.constant dense<0.000000e+00> : vector<4x16xf32>
    %46 = tpu.matmul %44, %45, %cst_32 {dimension_numbers = #tpu.dot_dimension_numbers<[1], [0], [0], [1], [0, 0, 1, 1], [], []>} : vector<4x768xbf16>, vector<768x16xbf16>, vector<4x16xf32> -> vector<4x16xf32>
    %47 = arith.truncf %46 : vector<4x16xf32> to vector<4x16xbf16>
    %c8 = arith.constant 8 : index
    %c0_33 = arith.constant 0 : index
    %48 = vector.load %arg4[%c8, %c0_33] : memref<16x256xbf16, #tpu.memory_space<vmem>>, vector<4x256xbf16>
    %49 = vector.extract_strided_slice %47 {offsets = [0, 0], sizes = [4, 4], strides = [1, 1]} : vector<4x16xbf16> to vector<4x4xbf16>
    %cst_34 = arith.constant dense<0.000000e+00> : vector<4x256xf32>
    %50 = tpu.matmul %49, %48, %cst_34 {dimension_numbers = #tpu.dot_dimension_numbers<[1], [0], [0], [1], [0, 0, 1, 1], [], []>} : vector<4x4xbf16>, vector<4x256xbf16>, vector<4x256xf32> -> vector<4x256xf32>
    %51 = arith.addf %33, %50 : vector<4x256xf32>
    %52 = vector.extract_strided_slice %47 {offsets = [0, 4], sizes = [4, 4], strides = [1, 1]} : vector<4x16xbf16> to vector<4x4xbf16>
    %cst_35 = arith.constant dense<0.000000e+00> : vector<4x256xf32>
    %53 = tpu.matmul %52, %48, %cst_35 {dimension_numbers = #tpu.dot_dimension_numbers<[1], [0], [0], [1], [0, 0, 1, 1], [], []>} : vector<4x4xbf16>, vector<4x256xbf16>, vector<4x256xf32> -> vector<4x256xf32>
    %54 = arith.addf %36, %53 : vector<4x256xf32>
    %55 = vector.extract_strided_slice %47 {offsets = [0, 8], sizes = [4, 4], strides = [1, 1]} : vector<4x16xbf16> to vector<4x4xbf16>
    %cst_36 = arith.constant dense<0.000000e+00> : vector<4x256xf32>
    %56 = tpu.matmul %55, %48, %cst_36 {dimension_numbers = #tpu.dot_dimension_numbers<[1], [0], [0], [1], [0, 0, 1, 1], [], []>} : vector<4x4xbf16>, vector<4x256xbf16>, vector<4x256xf32> -> vector<4x256xf32>
    %57 = arith.addf %39, %56 : vector<4x256xf32>
    %58 = vector.extract_strided_slice %47 {offsets = [0, 12], sizes = [4, 4], strides = [1, 1]} : vector<4x16xbf16> to vector<4x4xbf16>
    %cst_37 = arith.constant dense<0.000000e+00> : vector<4x256xf32>
    %59 = tpu.matmul %58, %48, %cst_37 {dimension_numbers = #tpu.dot_dimension_numbers<[1], [0], [0], [1], [0, 0, 1, 1], [], []>} : vector<4x4xbf16>, vector<4x256xbf16>, vector<4x256xf32> -> vector<4x256xf32>
    %60 = arith.addf %42, %59 : vector<4x256xf32>
    %c0_38 = arith.constant 0 : index
    %c3 = arith.constant 3 : index
    %c0_39 = arith.constant 0 : index
    %c0_40 = arith.constant 0 : index
    %61 = vector.load %arg2[%c0_38, %c3, %c0_39, %c0_40] : memref<1x4x4x768xbf16, #tpu.memory_space<vmem>>, vector<1x1x4x768xbf16>
    %62 = vector.shape_cast %61 : vector<1x1x4x768xbf16> to vector<4x768xbf16>
    %c0_41 = arith.constant 0 : index
    %c0_42 = arith.constant 0 : index
    %63 = vector.load %arg3[%c0_41, %c0_42] : memref<768x16xbf16, #tpu.memory_space<vmem>>, vector<768x16xbf16>
    %cst_43 = arith.constant dense<0.000000e+00> : vector<4x16xf32>
    %64 = tpu.matmul %62, %63, %cst_43 {dimension_numbers = #tpu.dot_dimension_numbers<[1], [0], [0], [1], [0, 0, 1, 1], [], []>} : vector<4x768xbf16>, vector<768x16xbf16>, vector<4x16xf32> -> vector<4x16xf32>
    %65 = arith.truncf %64 : vector<4x16xf32> to vector<4x16xbf16>
    %c12 = arith.constant 12 : index
    %c0_44 = arith.constant 0 : index
    %66 = vector.load %arg4[%c12, %c0_44] : memref<16x256xbf16, #tpu.memory_space<vmem>>, vector<4x256xbf16>
    %67 = vector.extract_strided_slice %65 {offsets = [0, 0], sizes = [4, 4], strides = [1, 1]} : vector<4x16xbf16> to vector<4x4xbf16>
    %cst_45 = arith.constant dense<0.000000e+00> : vector<4x256xf32>
    %68 = tpu.matmul %67, %66, %cst_45 {dimension_numbers = #tpu.dot_dimension_numbers<[1], [0], [0], [1], [0, 0, 1, 1], [], []>} : vector<4x4xbf16>, vector<4x256xbf16>, vector<4x256xf32> -> vector<4x256xf32>
    %69 = arith.addf %51, %68 : vector<4x256xf32>
    %70 = vector.extract_strided_slice %65 {offsets = [0, 4], sizes = [4, 4], strides = [1, 1]} : vector<4x16xbf16> to vector<4x4xbf16>
    %cst_46 = arith.constant dense<0.000000e+00> : vector<4x256xf32>
    %71 = tpu.matmul %70, %66, %cst_46 {dimension_numbers = #tpu.dot_dimension_numbers<[1], [0], [0], [1], [0, 0, 1, 1], [], []>} : vector<4x4xbf16>, vector<4x256xbf16>, vector<4x256xf32> -> vector<4x256xf32>
    %72 = arith.addf %54, %71 : vector<4x256xf32>
    %73 = vector.extract_strided_slice %65 {offsets = [0, 8], sizes = [4, 4], strides = [1, 1]} : vector<4x16xbf16> to vector<4x4xbf16>
    %cst_47 = arith.constant dense<0.000000e+00> : vector<4x256xf32>
    %74 = tpu.matmul %73, %66, %cst_47 {dimension_numbers = #tpu.dot_dimension_numbers<[1], [0], [0], [1], [0, 0, 1, 1], [], []>} : vector<4x4xbf16>, vector<4x256xbf16>, vector<4x256xf32> -> vector<4x256xf32>
    %75 = arith.addf %57, %74 : vector<4x256xf32>
    %76 = vector.extract_strided_slice %65 {offsets = [0, 12], sizes = [4, 4], strides = [1, 1]} : vector<4x16xbf16> to vector<4x4xbf16>
    %cst_48 = arith.constant dense<0.000000e+00> : vector<4x256xf32>
    %77 = tpu.matmul %76, %66, %cst_48 {dimension_numbers = #tpu.dot_dimension_numbers<[1], [0], [0], [1], [0, 0, 1, 1], [], []>} : vector<4x4xbf16>, vector<4x256xbf16>, vector<4x256xf32> -> vector<4x256xf32>
    %78 = arith.addf %60, %77 : vector<4x256xf32>
    %c0_49 = arith.constant 0 : index
    %c0_50 = arith.constant 0 : index
    %c0_51 = arith.constant 0 : index
    %79 = vector.load %arg8[%c0_49, %c0_50, %c0_51] : memref<4x4x256xf32, #tpu.memory_space<vmem>>, vector<1x4x256xf32>
    %80 = vector.shape_cast %79 : vector<1x4x256xf32> to vector<4x256xf32>
    %81 = arith.addf %80, %69 : vector<4x256xf32>
    %c0_52 = arith.constant 0 : index
    %c0_53 = arith.constant 0 : index
    %c0_54 = arith.constant 0 : index
    %82 = vector.load %arg8[%c0_52, %c0_53, %c0_54] : memref<4x4x256xf32, #tpu.memory_space<vmem>>, vector<1x4x256xf32>
    %83 = vector.shape_cast %82 : vector<1x4x256xf32> to vector<4x256xf32>
    %84 = vector.shape_cast %81 : vector<4x256xf32> to vector<1x4x256xf32>
    tpu.vector_store %arg8[%c0_52, %c0_53, %c0_54], %84 {strides = array<i32>} : memref<4x4x256xf32, #tpu.memory_space<vmem>>, vector<1x4x256xf32>,
    %c1_55 = arith.constant 1 : index
    %c0_56 = arith.constant 0 : index
    %c0_57 = arith.constant 0 : index
    %85 = vector.load %arg8[%c1_55, %c0_56, %c0_57] : memref<4x4x256xf32, #tpu.memory_space<vmem>>, vector<1x4x256xf32>
    %86 = vector.shape_cast %85 : vector<1x4x256xf32> to vector<4x256xf32>
    %87 = arith.addf %86, %72 : vector<4x256xf32>
    %c1_58 = arith.constant 1 : index
    %c0_59 = arith.constant 0 : index
    %c0_60 = arith.constant 0 : index
    %88 = vector.load %arg8[%c1_58, %c0_59, %c0_60] : memref<4x4x256xf32, #tpu.memory_space<vmem>>, vector<1x4x256xf32>
    %89 = vector.shape_cast %88 : vector<1x4x256xf32> to vector<4x256xf32>
    %90 = vector.shape_cast %87 : vector<4x256xf32> to vector<1x4x256xf32>
    tpu.vector_store %arg8[%c1_58, %c0_59, %c0_60], %90 {strides = array<i32>} : memref<4x4x256xf32, #tpu.memory_space<vmem>>, vector<1x4x256xf32>,
    %c2_61 = arith.constant 2 : index
    %c0_62 = arith.constant 0 : index
    %c0_63 = arith.constant 0 : index
    %91 = vector.load %arg8[%c2_61, %c0_62, %c0_63] : memref<4x4x256xf32, #tpu.memory_space<vmem>>, vector<1x4x256xf32>
    %92 = vector.shape_cast %91 : vector<1x4x256xf32> to vector<4x256xf32>
    %93 = arith.addf %92, %75 : vector<4x256xf32>
    %c2_64 = arith.constant 2 : index
    %c0_65 = arith.constant 0 : index
    %c0_66 = arith.constant 0 : index
    %94 = vector.load %arg8[%c2_64, %c0_65, %c0_66] : memref<4x4x256xf32, #tpu.memory_space<vmem>>, vector<1x4x256xf32>
    %95 = vector.shape_cast %94 : vector<1x4x256xf32> to vector<4x256xf32>
    %96 = vector.shape_cast %93 : vector<4x256xf32> to vector<1x4x256xf32>
    tpu.vector_store %arg8[%c2_64, %c0_65, %c0_66], %96 {strides = array<i32>} : memref<4x4x256xf32, #tpu.memory_space<vmem>>, vector<1x4x256xf32>,
    %c3_67 = arith.constant 3 : index
    %c0_68 = arith.constant 0 : index
    %c0_69 = arith.constant 0 : index
    %97 = vector.load %arg8[%c3_67, %c0_68, %c0_69] : memref<4x4x256xf32, #tpu.memory_space<vmem>>, vector<1x4x256xf32>
    %98 = vector.shape_cast %97 : vector<1x4x256xf32> to vector<4x256xf32>
    %99 = arith.addf %98, %78 : vector<4x256xf32>
    %c3_70 = arith.constant 3 : index
    %c0_71 = arith.constant 0 : index
    %c0_72 = arith.constant 0 : index
    %100 = vector.load %arg8[%c3_70, %c0_71, %c0_72] : memref<4x4x256xf32, #tpu.memory_space<vmem>>, vector<1x4x256xf32>
    %101 = vector.shape_cast %100 : vector<1x4x256xf32> to vector<4x256xf32>
    %102 = vector.shape_cast %99 : vector<4x256xf32> to vector<1x4x256xf32>
    tpu.vector_store %arg8[%c3_70, %c0_71, %c0_72], %102 {strides = array<i32>} : memref<4x4x256xf32, #tpu.memory_space<vmem>>, vector<1x4x256xf32>,
    %c0_i32_73 = arith.constant 0 : i32
    %103 = arith.cmpi eq, %arg1, %c0_i32_73 : i32
    %104 = arith.extui %103 : i1 to i32
    %c0_i32_74 = arith.constant 0 : i32
    %105 = arith.cmpi ne, %104, %c0_i32_74 : i32
    scf.if %105 {
      %c0_75 = arith.constant 0 : index
      %c0_76 = arith.constant 0 : index
      %106 = vector.load %arg6[%c0_75, %c0_76] : memref<200x256xf32, #tpu.memory_space<vmem>>, vector<200x256xf32>
      %c0_77 = arith.constant 0 : index
      %c0_78 = arith.constant 0 : index
      %107 = vector.load %arg5[%c0_77, %c0_78] : memref<200x16xbf16, #tpu.memory_space<vmem>>, vector<200x4xbf16>
      %c0_79 = arith.constant 0 : index
      %c0_80 = arith.constant 0 : index
      %c0_81 = arith.constant 0 : index
      %108 = vector.load %arg8[%c0_79, %c0_80, %c0_81] : memref<4x4x256xf32, #tpu.memory_space<vmem>>, vector<1x4x256xf32>
      %109 = vector.shape_cast %108 : vector<1x4x256xf32> to vector<4x256xf32>
      %110 = arith.truncf %109 : vector<4x256xf32> to vector<4x256xbf16>
      %cst_82 = arith.constant dense<0.000000e+00> : vector<200x256xf32>
      %111 = tpu.matmul %107, %110, %cst_82 {dimension_numbers = #tpu.dot_dimension_numbers<[1], [0], [0], [1], [0, 0, 1, 1], [], []>} : vector<200x4xbf16>, vector<4x256xbf16>, vector<200x256xf32> -> vector<200x256xf32>
      %112 = arith.addf %106, %111 : vector<200x256xf32>
      %c0_83 = arith.constant 0 : index
      %c4_84 = arith.constant 4 : index
      %113 = vector.load %arg5[%c0_83, %c4_84] : memref<200x16xbf16, #tpu.memory_space<vmem>>, vector<200x4xbf16>
      %c1_85 = arith.constant 1 : index
      %c0_86 = arith.constant 0 : index
      %c0_87 = arith.constant 0 : index
      %114 = vector.load %arg8[%c1_85, %c0_86, %c0_87] : memref<4x4x256xf32, #tpu.memory_space<vmem>>, vector<1x4x256xf32>
      %115 = vector.shape_cast %114 : vector<1x4x256xf32> to vector<4x256xf32>
      %116 = arith.truncf %115 : vector<4x256xf32> to vector<4x256xbf16>
      %cst_88 = arith.constant dense<0.000000e+00> : vector<200x256xf32>
      %117 = tpu.matmul %113, %116, %cst_88 {dimension_numbers = #tpu.dot_dimension_numbers<[1], [0], [0], [1], [0, 0, 1, 1], [], []>} : vector<200x4xbf16>, vector<4x256xbf16>, vector<200x256xf32> -> vector<200x256xf32>
      %118 = arith.addf %112, %117 : vector<200x256xf32>
      %c0_89 = arith.constant 0 : index
      %c8_90 = arith.constant 8 : index
      %119 = vector.load %arg5[%c0_89, %c8_90] : memref<200x16xbf16, #tpu.memory_space<vmem>>, vector<200x4xbf16>
      %c2_91 = arith.constant 2 : index
      %c0_92 = arith.constant 0 : index
      %c0_93 = arith.constant 0 : index
      %120 = vector.load %arg8[%c2_91, %c0_92, %c0_93] : memref<4x4x256xf32, #tpu.memory_space<vmem>>, vector<1x4x256xf32>
      %121 = vector.shape_cast %120 : vector<1x4x256xf32> to vector<4x256xf32>
      %122 = arith.truncf %121 : vector<4x256xf32> to vector<4x256xbf16>
      %cst_94 = arith.constant dense<0.000000e+00> : vector<200x256xf32>
      %123 = tpu.matmul %119, %122, %cst_94 {dimension_numbers = #tpu.dot_dimension_numbers<[1], [0], [0], [1], [0, 0, 1, 1], [], []>} : vector<200x4xbf16>, vector<4x256xbf16>, vector<200x256xf32> -> vector<200x256xf32>
      %124 = arith.addf %118, %123 : vector<200x256xf32>
      %c0_95 = arith.constant 0 : index
      %c12_96 = arith.constant 12 : index
      %125 = vector.load %arg5[%c0_95, %c12_96] : memref<200x16xbf16, #tpu.memory_space<vmem>>, vector<200x4xbf16>
      %c3_97 = arith.constant 3 : index
      %c0_98 = arith.constant 0 : index
      %c0_99 = arith.constant 0 : index
      %126 = vector.load %arg8[%c3_97, %c0_98, %c0_99] : memref<4x4x256xf32, #tpu.memory_space<vmem>>, vector<1x4x256xf32>
      %127 = vector.shape_cast %126 : vector<1x4x256xf32> to vector<4x256xf32>
      %128 = arith.truncf %127 : vector<4x256xf32> to vector<4x256xbf16>
      %cst_100 = arith.constant dense<0.000000e+00> : vector<200x256xf32>
      %129 = tpu.matmul %125, %128, %cst_100 {dimension_numbers = #tpu.dot_dimension_numbers<[1], [0], [0], [1], [0, 0, 1, 1], [], []>} : vector<200x4xbf16>, vector<4x256xbf16>, vector<200x256xf32> -> vector<200x256xf32>
      %130 = arith.addf %124, %129 : vector<200x256xf32>
      %131 = arith.negf %130 : vector<200x256xf32>
      %132 = math.exp %131 : vector<200x256xf32>
      %cst_101 = arith.constant 1.000000e+00 : f32
      %133 = vector.broadcast %cst_101 : f32 to vector<200x256xf32>
      %134 = arith.addf %133, %132 : vector<200x256xf32>
      %135 = arith.divf %133, %134 : vector<200x256xf32>
      %c0_102 = arith.constant 0 : index
      %c0_103 = arith.constant 0 : index
      %c0_104 = arith.constant 0 : index
      %136 = vector.load %arg7[%c0_102, %c0_103, %c0_104] : memref<1x200x256xf32, #tpu.memory_space<vmem>>, vector<1x200x256xf32>
      %137 = vector.shape_cast %136 : vector<1x200x256xf32> to vector<200x256xf32>
      %138 = vector.shape_cast %135 : vector<200x256xf32> to vector<1x200x256xf32>
      tpu.vector_store %arg7[%c0_102, %c0_103, %c0_104], %138 {strides = array<i32>} : memref<1x200x256xf32, #tpu.memory_space<vmem>>, vector<1x200x256xf32>,
    } else {
    }
    return
  }
  func.func @transform_0(%arg0: i32, %arg1: i32) -> (i32, i32, i32, i32) {
    %c0_i32 = arith.constant 0 : i32
    %c0_i32_0 = arith.constant 0 : i32
    %c0_i32_1 = arith.constant 0 : i32
    return %arg0, %arg1, %c0_i32, %c0_i32_0 : i32, i32, i32, i32
  }
  func.func @transform_1(%arg0: i32, %arg1: i32) -> (i32, i32) {
    %c0_i32 = arith.constant 0 : i32
    %c0_i32_0 = arith.constant 0 : i32
    %c0_i32_1 = arith.constant 0 : i32
    return %c0_i32, %c0_i32_0 : i32, i32
  }
  func.func @transform_2(%arg0: i32, %arg1: i32) -> (i32, i32) {
    %c0_i32 = arith.constant 0 : i32
    %c0_i32_0 = arith.constant 0 : i32
    return %arg1, %c0_i32 : i32, i32
  }
  func.func @transform_3(%arg0: i32, %arg1: i32) -> (i32, i32) {
    %c0_i32 = arith.constant 0 : i32
    %c0_i32_0 = arith.constant 0 : i32
    %c0_i32_1 = arith.constant 0 : i32
    return %c0_i32, %c0_i32_0 : i32, i32
  }
  func.func @transform_4(%arg0: i32, %arg1: i32) -> (i32, i32) {
    %c0_i32 = arith.constant 0 : i32
    %c0_i32_0 = arith.constant 0 : i32
    %c0_i32_1 = arith.constant 0 : i32
    return %c0_i32, %c0_i32_0 : i32, i32
  }
  func.func @transform_5(%arg0: i32, %arg1: i32) -> (i32, i32, i32) {
    %c0_i32 = arith.constant 0 : i32
    %c0_i32_0 = arith.constant 0 : i32
    %c0_i32_1 = arith.constant 0 : i32
    return %arg0, %c0_i32, %c0_i32_0 : i32, i32, i32
  }
}

</mosaic_0001>

<bundles_post_ra>
// kernel: sam_forward.1
= control target key start
LH: loop header
LB: loop body
LE: loop exit
PB: predicated region body
PF: predicated region fallthrough
CT: control target
= control target key end

     0   :  { %10 = vsyncpa [#allocation4], 0  ;;  %s6818_s0 = inlined_call_operand.vmem [shape: bf16[2,4,4,768], index: 0, kind: input, shape index: {}]   ;;  %s6819_s1 = inlined_call_operand.vmem [shape: bf16[768,16], index: 1, kind: input, shape index: {}]   ;;  %s6820_s2 = inlined_call_operand.vmem [shape: bf16[16,256], index: 2, kind: input, shape index: {}]   ;;  %s6821_s3 = inlined_call_operand.vmem [shape: bf16[200,16], index: 3, kind: input, shape index: {}]   ;;  %s6822_s4 = inlined_call_operand.vmem [shape: f32[200,256], index: 4, kind: input, shape index: {}]   ;;  %s6823_s5 = inlined_call_operand.hbm [shape: f32[2,200,256], index: 5, kind: output, shape index: {}]  }
   0x1   :  { %12 = vsyncpa [#allocation4 + $0x1], 0  ;;  %s5427_s18 = smov 0   ;;  %s5429_s19 = smov 0  }
   0x2   :  { %s5431_s20 = smov 0   ;;  %s5433_s21 = smov 0  }
   0x3   :  { %s5435_s22 = smov 0   ;;  %s5437_s23 = smov 0  }
   0x4 LB: > { %s4121_s24 = sadd.s32 4294967295, %s5387_s23   ;;  %s4122_s25 = sadd.s32 4294967294, %s5387_s23   ;;  %s5387_s23 = sphi %s5437_s23, %s18_s23   ;;  %s5383_s22 = sphi %s5435_s22, %s6887_s22   ;;  %s5379_s21 = sphi %s5433_s21, %s6886_s21   ;;  %s5375_s20 = sphi %s5431_s20, %s6885_s20   ;;  %s5371_s19 = sphi %s5429_s19, %s6884_s19   ;;  %s5367_s18 = sphi %s5427_s18, %s6883_s18  }
   0x5   : > { %s30_s26 = sadd.s32 1, %s5383_s22  ;;  %s154_s27 = sadd.s32 1, %s5375_s20 }
   0x6   : > { %p32_p0 = scmp.ge.s32.totalorder %s30_s26, 2  ;;  %p164_p1 = scmp.ne.s32.totalorder %s5375_s20, %s5371_s19 }
   0x7   : > { %p165_p2 = scmp.eq.s32.totalorder %s4121_s24, 1  ;;  %p170_p3 = scmp.ne.s32.totalorder %s5371_s19, %s5367_s18 }
   0x8   : > { %s6889_s26 = smov (%p32_p0, %s30_s26), 0  ;;  %p171_p5 = scmp.eq.s32.totalorder %s4122_s25, 1 }
   0x9   : > { %p5467_p4 = por %p165_p2, %p164_p1  ;;  %s151_s29 = ssub.s32 %s5383_s22, %s6889_s26 }
   0xa   : > { %p4126_p6 = scmp.ge.s32.totalorder %s5387_s23, 1  ;;  %p152_p7 = scmp.eq.s32.totalorder %s151_s29, 0 }
   0xb   : > { %p5474_p8 = por %p171_p5, %p170_p3  ;;  %p222_p9 = scmp.lt.s32.totalorder %s5387_s23, 3 }
   0xc   : > { %s5480_s6 = scalar_select %p152_p7, %s5375_s20, %s154_s27  }
   0xd   : > { %p223_p10 = pnand %p4126_p6, %p222_p9 }
   0xf   : > { %226 = sbr.rel (%p223_p10) target bundleno = 1954 (0x7a2), region = 40 }
  0x16   : > { %v5485_v0 = vld [vmem:[%s6819_s1 + $0x40] sm:$0xff]   ;;  %v5508_v4 = vld [vmem:[%s6819_s1 + $0x48] sm:$0xff]   ;;  %v5532_v8 = vld [vmem:[%s6819_s1 + $0x50] sm:$0xff]   ;;  %p262_p11 = scmp.lt.s32.totalorder %s5379_s21, 1  ;;  %v392_v28 = vlaneseq  ;;  %v5389_v36 = vmov 1983009808  }
  0x17   : > { %v5490_v1 = vld [vmem:[%s6819_s1 + $0xc0] sm:$0xff]   ;;  %4391 = vmatprep.subr.bf16.mxu0 %v5485_v0  ;;  %v5514_v5 = vld [vmem:[%s6819_s1 + $0xc8] sm:$0xff]   ;;  %v5538_v9 = vld [vmem:[%s6819_s1 + $0xd0] sm:$0xff]   ;;  %v390_v37 = vunpack.c.l.s4 %v5389_v36  ;;  %vm998_vm0 = vcmask 1041408   ;;  %s5391_s9 = smov 120   ;;  %s5392_s10 = smov 124  }
  0x18   : > { %v5496_v2 = vld [vmem:[%s6819_s1] sm:$0xff]   ;;  %4413 = vmatprep.subr.bf16.mxu1 %v5490_v1  ;;  %v5520_v6 = vld [vmem:[%s6819_s1 + $0x8] sm:$0xff]   ;;  %v5544_v10 = vld [vmem:[%s6819_s1 + $0x10] sm:$0xff]   ;;  %s263_s29 = scalar_select %p262_p11, %s5379_s21, 1  ;;  %v393_v33 = vshrl.u32 %v392_v28, 7  ;;  %vm994_vm1 = vcmask 31744  }
  0x19   : > { %v5502_v3 = vld [vmem:[%s6819_s1 + $0x80] sm:$0xff]   ;;  %4392 = vmatpush3.bf16.msra.mxu0 %v5496_v2  ;;  %v5526_v7 = vld [vmem:[%s6819_s1 + $0x88] sm:$0xff]   ;;  %v5550_v11 = vld [vmem:[%s6819_s1 + $0x90] sm:$0xff]   ;;  %v391_v38 = vunpack.c.0.s8 %v390_v37  ;;  %s5393_s12 = smov 116   ;;  %s258_s25 = sand.u32 1, %s5371_s19  }
  0x1a   : > { %4414 = vmatpush3.bf16.msra.mxu1 %v5502_v3  ;;  %4393 = vmatprep.subr.bf16.mxu0 %v5508_v4  ;;  %v5556_v12 = vld [vmem:[%s6819_s1 + $0x58] sm:$0xff]   ;;  %v5580_v16 = vld [vmem:[%s6819_s1 + $0x60] sm:$0xff]   ;;  %v5605_v20 = vld [vmem:[%s6819_s1 + $0x68] sm:$0xff]   ;;  %s4908_s15 = smul.u32 48, %s263_s29  ;;  %s5394_s7 = smov [#allocation3]  }
  0x1b   : > { %4415 = vmatprep.subr.bf16.mxu1 %v5514_v5  ;;  %v5562_v13 = vld [vmem:[%s6819_s1 + $0xd8] sm:$0xff]   ;;  %v5586_v17 = vld [vmem:[%s6819_s1 + $0xe0] sm:$0xff]   ;;  %v5611_v21 = vld [vmem:[%s6819_s1 + $0xe8] sm:$0xff]   ;;  %v5689_v40 = vsub.s32 %v391_v38, %v393_v33  ;;  %s6563_s29 = smul.u32 400, %s258_s25 }
  0x1c   : > { %v5568_v14 = vld [vmem:[%s6819_s1 + $0x18] sm:$0xff]   ;;  %v5593_v18 = vld [vmem:[%s6819_s1 + $0x20] sm:$0xff]   ;;  %v5618_v22 = vld [vmem:[%s6819_s1 + $0x28] sm:$0xff]   ;;  %s5665_s11 = scalar_lea.vmem %s6818_s0, %s4908_s15  ;;  %s4909_s17 = smul.u32 6400, %s5379_s21 }
  0x1d   : > { %4394 = vmatpush3.bf16.msra.mxu0 %v5520_v6  ;;  %v5574_v15 = vld [vmem:[%s6819_s1 + $0x98] sm:$0xff]   ;;  %v5599_v19 = vld [vmem:[%s6819_s1 + $0xa0] sm:$0xff]   ;;  %v5624_v23 = vld [vmem:[%s6819_s1 + $0xa8] sm:$0xff]   ;;  %s6579_s24 = scalar_lea.vmem [#allocation3], %s6563_s29  ;;  %s5313_s29 = sshll.u32 %s5394_s7, 4  ;;  %s5314_s29 = int_to_ptr.vmem [resolvable:$false] %s5313_s29 }
  0x1e   : > { %4416 = vmatpush3.bf16.msra.mxu1 %v5526_v7  ;;  %4395 = vmatprep.subr.bf16.mxu0 %v5532_v8  ;;  %v5630_v24 = vld [vmem:[%s6819_s1 + $0x70] sm:$0xff]   ;;  %v5654_v29 = vld [vmem:[%s6819_s1 + $0x78] sm:$0xff]   ;;  %v288_v34 = vld [vmem:[%s5665_s11] sm:$0xff]  ;;  %s4027_s27 = sshll.u32 %s6579_s24, 4  ;;  %s5315_s8 = scalar_lea.vmem %s5314_s29, 12800  ;;  %s6767_s27 = int_to_ptr.vmem [resolvable:$true] %s4027_s27 }
  0x1f   : > { %4417 = vmatprep.subr.bf16.mxu1 %v5538_v9  ;;  %v5636_v25 = vld [vmem:[%s6819_s1 + $0xf0] sm:$0xff]   ;;  %v5660_v30 = vld [vmem:[%s6819_s1 + $0xf8] sm:$0xff]   ;;  %v5684_v35 = vld [vmem:[%s6819_s1 + $0x140] sm:$0xff]   ;;  %v388_v39 = vcombine.high %v288_v34, %v288_v34  ;;  %v395_v41 = vrot.slane %v288_v34, %v5689_v40  ;;  %s5309_s21 = scalar_lea.vmem %s6767_s27, 6400  ;;  %p5316_p1 = scmp.lt.s32.totalorder %s6767_s27, %s5314_s29 }
  0x20   : > { %6852 = vst [vmem:[#allocation6_spill] sm:$0xff] %v5636_v25  ;;  %v5642_v26 = vld [vmem:[%s6819_s1 + $0x30] sm:$0xff]   ;;  %6854 = vst [vmem:[#allocation8_spill] sm:$0xff] %v5660_v30  ;;  %v5671_v31 = vld [vmem:[%s6819_s1 + $0x38] sm:$0xff]   ;;  %p5310_p12 = scmp.ne.s32.totalorder %s6767_s27, %s5309_s21  ;;  %p5317_p2 = scmp.lt.s32.totalorder %s5315_s8, %s5309_s21 }
  0x21   : > { %4396 = vmatpush3.bf16.msra.mxu0 %v5544_v10  ;;  %v5648_v27 = vld [vmem:[%s6819_s1 + $0xb0] sm:$0xff]   ;;  %v5677_v32 = vld [vmem:[%s6819_s1 + $0xb8] sm:$0xff]   ;;  %v402_v42 = vrot.slane %v388_v39, %v5689_v40  ;;  %v403_v43 = vcombine.high %v395_v41, %v395_v41  ;;  %v5696_v45 = vld [vmem:[%s6819_s1 + $0x100] sm:$0xff]  }
  0x22   : > { %4418 = vmatpush3.bf16.msra.mxu1 %v5550_v11  ;;  %4397 = vmatprep.subr.bf16.mxu0 %v5556_v12  ;;  %6853 = vst [vmem:[#allocation7_spill] sm:$0xff] %v5648_v27  ;;  %6855 = vst [vmem:[#allocation9_spill] sm:$0xff] %v5677_v32  ;;  %v5701_v46 = vld [vmem:[%s6819_s1 + $0x148] sm:$0xff]   ;;  %v5715_v48 = vld [vmem:[%s6819_s1 + $0x150] sm:$0xff]   ;;  %p5311_p13 = pnand %p5310_p12, %p5467_p4  ;;  %p5318_p3 = por %p5317_p2, %p5316_p1 }
  0x23   : > { %4419 = vmatprep.subr.bf16.mxu1 %v5562_v13  ;;  %v404_v44 = vcombine.high %v402_v42, %v402_v42  ;;  %739 = vmatprep.mubr.bf16.mxu0 %v403_v43  ;;  %v5708_v47 = vld [vmem:[%s6819_s1 + $0x108] sm:$0xff]   ;;  %v5724_v51 = vld [vmem:[%s6819_s1 + $0x110] sm:$0xff]   ;;  %v5729_v52 = vld [vmem:[%s6819_s1 + $0x158] sm:$0xff]  }
  0x24   : > { %v4128_v49 = vld.sshfl [vmem:[%s5665_s11 + $0x8] sm:$0x33 pattern:$0x76325410]  ;;  %v4177_v50 = vld [vmem:[%s5665_s11 + $0xc] sm:$0xff]  ;;  %v5737_v55 = vld [vmem:[%s6819_s1 + $0x118] sm:$0xff]   ;;  %p5312_p0 = pneg %p5311_p13 }
  0x25   : > { %4398 = vmatpush3.bf16.msra.mxu0 %v5568_v14  ;;  %779 = vmatprep.mubr.bf16.mxu1 %v404_v44  ;;  %v412_v53 = vcombine.high %v4128_v49, %v4128_v49  ;;  %v841_v54 = vrot.slane %v4177_v50, %v5689_v40  ;;  %v5742_v57 = vld [vmem:[%s6819_s1 + $0x160] sm:$0xff]   ;;  %v5756_v59 = vld [vmem:[%s6819_s1 + $0x168] sm:$0xff]   ;;  %v5770_v61 = vld [vmem:[%s6819_s1 + $0x170] sm:$0xff]   ;;  %v834_v33 = vcombine.high %v4177_v50, %v4177_v50  ;;  %v6824_v50 = vmov 0  }
  0x26   : > { %4420 = vmatpush3.bf16.msra.mxu1 %v5574_v15  ;;  %4399 = vmatprep.subr.bf16.mxu0 %v5580_v16  ;;  %6856 = vst [vmem:[#allocation10_spill] sm:$0xff] %v5742_v57  ;;  %v5751_v58 = vld [vmem:[%s6819_s1 + $0x120] sm:$0xff]   ;;  %6858 = vst [vmem:[#allocation12_spill] sm:$0xff] %v5756_v59  ;;  %v5765_v60 = vld [vmem:[%s6819_s1 + $0x128] sm:$0xff]   ;;  %p5319_p5 = pnand %p5318_p3, %p5312_p0 }
  0x27   : > { %4421 = vmatprep.subr.bf16.mxu1 %v5586_v17  ;;  %v849_v56 = vcombine.high %v841_v54, %v841_v54  ;;  %6857 = vst [vmem:[#allocation11_spill] sm:$0xff] %v5751_v58  ;;  %6859 = vst [vmem:[#allocation13_spill] sm:$0xff] %v5765_v60  ;;  %v5779_v62 = vld [vmem:[%s6819_s1 + $0x130] sm:$0xff]   ;;  %v5784_v63 = vld [vmem:[%s6819_s1 + $0x178] sm:$0xff]   ;;  %v848_v36 = vrot.slane %v834_v33, %v5689_v40 }
  0x28   : > { %6860 = vst [vmem:[#allocation14_spill] sm:$0xff] %v5770_v61  ;;  %6861 = vst [vmem:[#allocation15_spill] sm:$0xff] %v5779_v62  ;;  %v5793_v28 = vld [vmem:[%s6819_s1 + $0x138] sm:$0xff]   ;;  %v986_v39 = vld [vmem:[%s6820_s2] sm:$0xcc] }
  0x29   : > { %4400 = vmatpush3.bf16.msra.mxu0 %v5593_v18  ;;  %6862 = vst [vmem:[#allocation16_spill] sm:$0xff] %v5784_v63  ;;  %6863 = vst [vmem:[#allocation17_spill] sm:$0xff] %v5793_v28  ;;  %v4179_v34 = vld.sshfl [vmem:[%s5665_s11 + $0x14] sm:$0x33 pattern:$0x76325410]  ;;  %v850_v37 = vcombine.high %v848_v36, %v848_v36 }
  0x2a   : > { %4422 = vmatpush3.bf16.msra.mxu1 %v5599_v19  ;;  %4401 = vmatprep.subr.bf16.mxu0 %v5605_v20  ;;  %v858_v38 = vcombine.high %v4179_v34, %v4179_v34 }
  0x2b   : > { %4423 = vmatprep.subr.bf16.mxu1 %v5611_v21 }
  0x2d   : > { %4402 = vmatpush3.bf16.msra.mxu0 %v5618_v22 }
  0x2e   : > { %4424 = vmatpush3.bf16.msra.mxu1 %v5624_v23  ;;  %4403 = vmatprep.subr.bf16.mxu0 %v5630_v24 }
  0x2f   : > { %4425 = vmatprep.subr.bf16.mxu1 %v5636_v25 }
  0x31   : > { %4404 = vmatpush3.bf16.msra.mxu0 %v5642_v26 }
  0x32   : > { %4426 = vmatpush3.bf16.msra.mxu1 %v5648_v27  ;;  %4405 = vmatprep.subr.bf16.mxu0 %v5654_v29 }
  0x33   : > { %4427 = vmatprep.subr.bf16.mxu1 %v5660_v30 }
  0x35   : > { %4406 = vmatpush3.bf16.msra.mxu0 %v5671_v31 }
  0x36   : > { %4428 = vmatpush3.bf16.msra.mxu1 %v5677_v32  ;;  %4435 = vmatprep.subr.bf16.mxu0 %v5684_v35 }
  0x37   : > { %4457 = vmatprep.subr.bf16.mxu1 %v5485_v0 }
  0x38   : > { %740 = vmatmul.mubr.bf16.vlgmr.msra.gmra.mrb[0].mxu0 %v395_v41  ;;  %v4181_v41 = vcombine.high %v986_v39, %v986_v39 }
  0x39   : > { %780 = vmatmul.mubr.bf16.vlgmr.msra.gmra.mrb[0].mxu1 %v402_v42  ;;  %4436 = vmatpush3.bf16.msra.mxu0 %v5696_v45  ;;  %v4180_v42 = vcombine.low %v986_v39, %v986_v39 }
  0x3a   : > { %4458 = vmatpush3.bf16.msra.mxu1 %v5496_v2  ;;  %4437 = vmatprep.subr.bf16.mxu0 %v5701_v46  ;;  %v5838_v43 = vrot.slane %v4181_v41, 2 }
  0x3b   : > { %4459 = vmatprep.subr.bf16.mxu1 %v5508_v4  ;;  %819 = vmatprep.mubr.bf16.mxu0 %v412_v53  ;;  %v992_v44 = vrot.slane %v4180_v42, 2  ;;  %v828_v53 = vld [vmem:[%s6820_s2] sm:$0x33] }
  0x3c   : > { %897 = vmatprep.mubr.bf16.mxu1 %v849_v56 }
  0x3d   : > { %4438 = vmatpush3.bf16.msra.mxu0 %v5708_v47 }
  0x3e   : > { %4460 = vmatpush3.bf16.msra.mxu1 %v5520_v6  ;;  %4439 = vmatprep.subr.bf16.mxu0 %v5715_v48 }
  0x3f   : > { %4461 = vmatprep.subr.bf16.mxu1 %v5532_v8 }
  0x41   : > { %4440 = vmatpush3.bf16.msra.mxu0 %v5724_v51 }
  0x42   : > { %4462 = vmatpush3.bf16.msra.mxu1 %v5544_v10  ;;  %4441 = vmatprep.subr.bf16.mxu0 %v5729_v52 }
  0x43   : > { %4463 = vmatprep.subr.bf16.mxu1 %v5556_v12 }
  0x45   : > { %4442 = vmatpush3.bf16.msra.mxu0 %v5737_v55 }
  0x46   : > { %4464 = vmatpush3.bf16.msra.mxu1 %v5568_v14  ;;  %4443 = vmatprep.subr.bf16.mxu0 %v5742_v57 }
  0x47   : > { %4465 = vmatprep.subr.bf16.mxu1 %v5580_v16 }
  0x49   : > { %4444 = vmatpush3.bf16.msra.mxu0 %v5751_v58 }
  0x4a   : > { %4466 = vmatpush3.bf16.msra.mxu1 %v5593_v18  ;;  %4445 = vmatprep.subr.bf16.mxu0 %v5756_v59 }
  0x4b   : > { %4467 = vmatprep.subr.bf16.mxu1 %v5605_v20 }
  0x4d   : > { %4446 = vmatpush3.bf16.msra.mxu0 %v5765_v60 }
  0x4e   : > { %4468 = vmatpush3.bf16.msra.mxu1 %v5618_v22  ;;  %4447 = vmatprep.subr.bf16.mxu0 %v5770_v61 }
  0x4f   : > { %4469 = vmatprep.subr.bf16.mxu1 %v5630_v24 }
  0x51   : > { %4448 = vmatpush3.bf16.msra.mxu0 %v5779_v62 }
  0x52   : > { %4470 = vmatpush3.bf16.msra.mxu1 %v5642_v26  ;;  %4449 = vmatprep.subr.bf16.mxu0 %v5784_v63 }
  0x53   : > { %4471 = vmatprep.subr.bf16.mxu1 %v5654_v29 }
  0x55   : > { %4450 = vmatpush3.bf16.msra.mxu0 %v5793_v28 }
  0x56   : > { %4472 = vmatpush3.bf16.msra.mxu1 %v5671_v31  ;;  %4479 = vmatprep.subr.bf16.mxu0 %v5490_v1 }
  0x57   : > { %4501 = vmatprep.subr.bf16.mxu1 %v5684_v35 }
  0x58   : > { %820 = vmatmul.mubr.bf16.vlgmr.msra.gmra.mrb[4].mxu0 %v4128_v49  ;;  %v5843_v49 = vsel %vm998_vm0, %v992_v44, 0 }
  0x59   : > { %898 = vmatmul.mubr.bf16.vlgmr.msra.gmra.mrb[4].mxu1 %v841_v54  ;;  %4480 = vmatpush3.bf16.msra.mxu0 %v5502_v3  ;;  %v5854_v54 = vcombine.high %v828_v53, %v828_v53 }
  0x5a   : > { %4502 = vmatpush3.bf16.msra.mxu1 %v5696_v45  ;;  %4481 = vmatprep.subr.bf16.mxu0 %v5514_v5 }
  0x5b   : > { %4503 = vmatprep.subr.bf16.mxu1 %v5701_v46  ;;  %937 = vmatprep.mubr.bf16.mxu0 %v850_v37 }
  0x5c   : > { %977 = vmatprep.mubr.bf16.mxu1 %v858_v38 }
  0x5d   : > { %4482 = vmatpush3.bf16.msra.mxu0 %v5526_v7 }
  0x5e   : > { %4504 = vmatpush3.bf16.msra.mxu1 %v5708_v47  ;;  %4483 = vmatprep.subr.bf16.mxu0 %v5538_v9 }
  0x5f   : > { %4505 = vmatprep.subr.bf16.mxu1 %v5715_v48 }
  0x61   : > { %4484 = vmatpush3.bf16.msra.mxu0 %v5550_v11 }
  0x62   : > { %4506 = vmatpush3.bf16.msra.mxu1 %v5724_v51  ;;  %4485 = vmatprep.subr.bf16.mxu0 %v5562_v13 }
  0x63   : > { %4507 = vmatprep.subr.bf16.mxu1 %v5729_v52 }
  0x65   : > { %4486 = vmatpush3.bf16.msra.mxu0 %v5574_v15 }
  0x66   : > { %4508 = vmatpush3.bf16.msra.mxu1 %v5737_v55  ;;  %4487 = vmatprep.subr.bf16.mxu0 %v5586_v17 }
  0x67   : > { %4509 = vmatprep.subr.bf16.mxu1 %v5742_v57 }
  0x69   : > { %4488 = vmatpush3.bf16.msra.mxu0 %v5599_v19 }
  0x6a   : > { %4510 = vmatpush3.bf16.msra.mxu1 %v5751_v58  ;;  %4489 = vmatprep.subr.bf16.mxu0 %v5611_v21 }
  0x6b   : > { %4511 = vmatprep.subr.bf16.mxu1 %v5756_v59 }
  0x6d   : > { %4490 = vmatpush3.bf16.msra.mxu0 %v5624_v23 }
  0x6e   : > { %4512 = vmatpush3.bf16.msra.mxu1 %v5765_v60  ;;  %4491 = vmatprep.subr.bf16.mxu0 %v5636_v25 }
  0x6f   : > { %4513 = vmatprep.subr.bf16.mxu1 %v5770_v61 }
  0x71   : > { %4492 = vmatpush3.bf16.msra.mxu0 %v5648_v27 }
  0x72   : > { %4514 = vmatpush3.bf16.msra.mxu1 %v5779_v62  ;;  %4493 = vmatprep.subr.bf16.mxu0 %v5660_v30 }
  0x73   : > { %4515 = vmatprep.subr.bf16.mxu1 %v5784_v63 }
  0x75   : > { %4494 = vmatpush3.bf16.msra.mxu0 %v5677_v32 }
  0x76   : > { %4516 = vmatpush3.bf16.msra.mxu1 %v5793_v28  ;;  %4182 = vmatprep.subr.msk.bf16.mxu0 %vm998_vm0, %v5838_v43 }
  0x77   : > { %4188 = vmatprep.subr.msk.bf16.mxu1 %vm998_vm0, %v5838_v43 }
  0x78   : > { %938 = vmatmul.mubr.bf16.vlgmr.msra.gmra.mrb[8].mxu0 %v848_v36 }
  0x79   : > { %978 = vmatmul.mubr.bf16.vlgmr.msra.gmra.mrb[8].mxu1 %v4179_v34  ;;  %1006 = vmatpush1.bf16.msra.mxu0 %v5843_v49 }
  0x7a   : > { %1108 = vmatpush1.bf16.msra.mxu1 %v5843_v49  ;;  %1037 = vmatprep.mubr.bf16.mxu0 %v6824_v50 }
  0x7b   : > { %1139 = vmatprep.mubr.bf16.mxu1 %v6824_v50  ;;  %4186 = vmatprep.subr.msk.bf16.mxu0 %vm998_vm0, %v5854_v54 }
  0x7c   : > { %4190 = vmatprep.subr.msk.bf16.mxu1 %vm998_vm0, %v5854_v54 }
 0x10b   : > { %v4407_v56 = vpop.f32.mrb[0].mxu0 }
 0x10c   : > { %v4429_v33 = vpop.f32.mrb[0].mxu1  ;;  %v4408_v34 = vpop.f32.mrb[1].mxu0 }
 0x10d   : > { %v4430_v36 = vpop.f32.mrb[1].mxu1  ;;  %v4409_v37 = vadd.f32 %v4408_v34, %v4407_v56  ;;  %v4410_v39 = vpop.f32.mrb[2].mxu0 }
 0x10e   : > { %v4431_v38 = vadd.f32 %v4430_v36, %v4429_v33  ;;  %v4432_v41 = vpop.f32.mrb[2].mxu1  ;;  %v4411_v42 = vpop.f32.mrb[3].mxu0 }
 0x10f   : > { %v4433_v44 = vpop.f32.mrb[3].mxu1 }
 0x110   : > { %v782_v50 = vadd.f32 %v4431_v38, %v4409_v37  ;;  %v6864_v37 = vmov 0  }
 0x12b   : > { %v4451_v28 = vpop.f32.mrb[4].mxu0 }
 0x12c   : > { %v4473_v63 = vpop.f32.mrb[4].mxu1  ;;  %v4452_v62 = vpop.f32.mrb[5].mxu0 }
 0x12d   : > { %v4474_v61 = vpop.f32.mrb[5].mxu1  ;;  %v4453_v60 = vadd.f32 %v4452_v62, %v4451_v28  ;;  %v4454_v59 = vpop.f32.mrb[6].mxu0 }
 0x12e   : > { %v4475_v32 = vadd.f32 %v4474_v61, %v4473_v63  ;;  %v4476_v30 = vpop.f32.mrb[6].mxu1  ;;  %v4455_v58 = vpop.f32.mrb[7].mxu0  ;;  %v4184_v63 = vcombine.low %v828_v53, %v828_v53  ;;  %v4200_v53 = vld [vmem:[%s5665_s11 + $0x18] sm:$0xff] }
 0x12f   : > { %v4477_v27 = vpop.f32.mrb[7].mxu1  ;;  %v822_v57 = vadd.f32 %v4453_v60, %v782_v50 }
 0x130   : > { %v1055_v36 = vsel %vm998_vm0, %v4184_v63, 0 }
 0x131   : > { %v827_v25 = vpack.c.bf16 %v822_v57, %v822_v57 }
 0x133   : > { %1241 = vrot.lane.b32.xlu1 %v827_v25, %s5391_s9 }
 0x137   : > { %1149 = vrot.lane.b32.xlu1 %v827_v25, %s5392_s10 }
 0x13b   : > { %1333 = vrot.lane.b32.xlu1 %v827_v25, %s5393_s12 }
 0x14b   : > { %v4495_v56 = vpop.f32.mrb[8].mxu0 }
 0x14c   : > { %v4517_v33 = vpop.f32.mrb[8].mxu1  ;;  %v4496_v34 = vpop.f32.mrb[9].mxu0 }
 0x14d   : > { %v4518_v62 = vpop.f32.mrb[9].mxu1  ;;  %v4497_v61 = vadd.f32 %v4496_v34, %v4495_v56  ;;  %v4498_v30 = vpop.f32.mrb[10].mxu0 }
 0x14e   : > { %v4519_v59 = vadd.f32 %v4518_v62, %v4517_v33  ;;  %v4520_v58 = vpop.f32.mrb[10].mxu1  ;;  %v4499_v27 = vpop.f32.mrb[11].mxu0 }
 0x14f   : > { %v4521_v60 = vpop.f32.mrb[11].mxu1  ;;  %v940_v57 = vadd.f32 %v4497_v61, %v4475_v32 }
 0x151   : > { %v980_v28 = vadd.f32 %v4519_v59, %v940_v57 }
 0x153   : > { %v985_v50 = vpack.c.bf16 %v980_v28, %v980_v28  ;;  %v5284_v28 = vld [vmem:[%s6819_s1 + $0xc0] sm:$0xff]  }
 0x155   : > { %1195 = vrot.lane.b32.xlu0 %v985_v50, %s5391_s9  ;;  %4183 = vmatmul.mubr.msk.bf16.vlgmr.msra.gmra.mrb[12].mxu0 %vm994_vm1, %v985_v50 }
 0x156   : > { %1061 = vmatpush1.bf16.msra.mxu0 %v1055_v36  ;;  %1092 = vmatprep.mubr.bf16.mxu0 %v6864_v37 }
 0x157   : > { %4192 = vmatprep.subr.msk.bf16.mxu0 %vm998_vm0, %v5838_v43 }
 0x159   : > { %1102 = vrot.lane.b32.xlu0 %v985_v50, %s5392_s10 }
 0x15d   : > { %1287 = vrot.lane.b32.xlu0 %v985_v50, %s5393_s12  ;;  %v4213_v50 = vld [vmem:[%s5665_s11 + $0x24] sm:$0xff] }
 0x161   : > { %4187 = vmatmul.mubr.msk.bf16.vlgmr.msra.gmra.mrb[12].mxu0 %vm994_vm1, %v827_v25  ;;  %v1391_v25 = vrot.slane %v4200_v53, %v5689_v40 }
 0x162   : > { %1201 = vmatpush1.bf16.msra.mxu0 %v5843_v49  ;;  %1232 = vmatprep.mubr.bf16.mxu0 %v6864_v37 }
 0x163   : > { %4194 = vmatprep.subr.msk.bf16.mxu0 %vm998_vm0, %v5854_v54  ;;  %v1399_v41 = vcombine.high %v1391_v25, %v1391_v25 }
 0x1a5   : > { %v1242_v39 = vpop.permute.xlu1 %1241 }
 0x1c7   : > { %v1196_v32 = vpop.permute.xlu0 %1195 }
 0x1c8   : > { %4193 = vmatmul.mubr.msk.bf16.vlgmr.msra.gmra.mrb[16].mxu0 %vm994_vm1, %v1196_v32 }
 0x1c9   : > { %1247 = vmatpush1.bf16.msra.mxu0 %v1055_v36  ;;  %1278 = vmatprep.mubr.bf16.mxu0 %v6864_v37 }
 0x1ca   : > { %4523 = vmatprep.subr.bf16.mxu0 %v5485_v0  ;;  %v1150_v0 = vpop.permute.xlu1 %1149 }
 0x1cb   : > { %v1103_v38 = vpop.permute.xlu0 %1102 }
 0x1cc   : > { %4189 = vmatmul.mubr.msk.bf16.vlgmr.msra.gmra.mrb[12].mxu1 %vm994_vm1, %v1103_v38 }
 0x1cd   : > { %1155 = vmatpush1.bf16.msra.mxu1 %v1055_v36  ;;  %1186 = vmatprep.mubr.bf16.mxu1 %v6864_v37 }
 0x1ce   : > { %4196 = vmatprep.subr.msk.bf16.mxu1 %vm998_vm0, %v5838_v43 }
 0x1d4   : > { %4195 = vmatmul.mubr.msk.bf16.vlgmr.msra.gmra.mrb[16].mxu0 %vm994_vm1, %v1242_v39 }
 0x1d5   : > { %4524 = vmatpush3.bf16.msra.mxu0 %v5496_v2  ;;  %1447 = vmatprep.mubr.bf16.mxu0 %v1399_v41  ;;  %v1288_v2 = vpop.permute.xlu0 %1287  ;;  %v5973_v41 = vrot.slane %v4213_v50, %v5689_v40 }
 0x1d6   : > { %4525 = vmatprep.subr.bf16.mxu0 %v5508_v4  ;;  %v1384_v4 = vcombine.high %v4200_v53, %v4200_v53 }
 0x1d8   : > { %4191 = vmatmul.mubr.msk.bf16.vlgmr.msra.gmra.mrb[12].mxu1 %vm994_vm1, %v1150_v0  ;;  %v5286_v0 = vld [vmem:[%s6819_s1 + $0x80] sm:$0xff]  }
 0x1d9   : > { %4526 = vmatpush3.bf16.msra.mxu0 %v5520_v6  ;;  %1293 = vmatpush1.bf16.msra.mxu1 %v5843_v49  ;;  %v1398_v6 = vrot.slane %v1384_v4, %v5689_v40 }
 0x1da   : > { %4527 = vmatprep.subr.bf16.mxu0 %v5532_v8  ;;  %1324 = vmatprep.mubr.bf16.mxu1 %v6864_v37  ;;  %v1334_v8 = vpop.permute.xlu1 %1333 }
 0x1db   : > { %4198 = vmatprep.subr.msk.bf16.mxu1 %vm998_vm0, %v5854_v54 }
 0x1dd   : > { %4528 = vmatpush3.bf16.msra.mxu0 %v5544_v10  ;;  %v1400_v10 = vcombine.high %v1398_v6, %v1398_v6 }
 0x1de   : > { %4529 = vmatprep.subr.bf16.mxu0 %v5556_v12 }
 0x1e0   : > { %4197 = vmatmul.mubr.msk.bf16.vlgmr.msra.gmra.mrb[16].mxu1 %vm994_vm1, %v1288_v2  ;;  %v5287_v2 = vld [vmem:[%s6819_s1 + $0xc8] sm:$0xff]  }
 0x1e1   : > { %4530 = vmatpush3.bf16.msra.mxu0 %v5568_v14  ;;  %1339 = vmatpush1.bf16.msra.mxu1 %v1055_v36  ;;  %v6871_v14 = vld [vmem:[#allocation9_spill] sm:$0xff]  ;;  %v1744_v36 = vcombine.high %v4213_v50, %v4213_v50  ;;  %v5036_v50 = vld [vmem:[%s6821_s3 + $0x48] sm:$0xff]  }
 0x1e2   : > { %4531 = vmatprep.subr.bf16.mxu0 %v5580_v16  ;;  %1370 = vmatprep.mubr.bf16.mxu1 %v6864_v37  ;;  %v6873_v16 = vld [vmem:[#allocation14_spill] sm:$0xff] }
 0x1e3   : > { %4545 = vmatprep.subr.bf16.mxu1 %v5490_v1  ;;  %v4202_v1 = vld.sshfl [vmem:[%s5665_s11 + $0x20] sm:$0x33 pattern:$0x76325410]  ;;  %v5963_v32 = vrot.slane %v1744_v36, %v5689_v40  ;;  %v5037_v36 = vld [vmem:[%s6821_s3 + $0x58] sm:$0xff]  }
 0x1e4   : > { %v1408_v12 = vcombine.high %v4202_v1, %v4202_v1  ;;  %v5288_v40 = vld [vmem:[%s6819_s1] sm:$0xff]  }
 0x1e5   : > { %4532 = vmatpush3.bf16.msra.mxu0 %v5593_v18  ;;  %v6875_v18 = vld [vmem:[#allocation16_spill] sm:$0xff]  ;;  %v1760_v38 = vcombine.high %v5963_v32, %v5963_v32 }
 0x1e6   : > { %4533 = vmatprep.subr.bf16.mxu0 %v5605_v20  ;;  %v1536_v20 = vld [vmem:[%s6820_s2 + $0x8] sm:$0x33] }
 0x1e9   : > { %4534 = vmatpush3.bf16.msra.mxu0 %v5618_v22  ;;  %v4203_v22 = vcombine.low %v1536_v20, %v1536_v20 }
 0x1ea   : > { %4535 = vmatprep.subr.bf16.mxu0 %v5630_v24 }
 0x1ec   : > { %4199 = vmatmul.mubr.msk.bf16.vlgmr.msra.gmra.mrb[16].mxu1 %vm994_vm1, %v1334_v8  ;;  %v5289_v8 = vld [vmem:[%s6819_s1 + $0x88] sm:$0xff]  }
 0x1ed   : > { %4536 = vmatpush3.bf16.msra.mxu0 %v5642_v26  ;;  %4546 = vmatpush3.bf16.msra.mxu1 %v5502_v3  ;;  %v6865_v3 = vld [vmem:[#allocation6_spill] sm:$0xff] }
 0x1ee   : > { %4537 = vmatprep.subr.bf16.mxu0 %v5654_v29  ;;  %4547 = vmatprep.subr.bf16.mxu1 %v5514_v5  ;;  %v6866_v5 = vld [vmem:[#allocation10_spill] sm:$0xff] }
 0x1ef   : > { %1487 = vmatprep.mubr.bf16.mxu1 %v1400_v10  ;;  %v5290_v10 = vld [vmem:[%s6819_s1 + $0x48] sm:$0xff]  }
 0x1f1   : > { %4538 = vmatpush3.bf16.msra.mxu0 %v5671_v31  ;;  %4548 = vmatpush3.bf16.msra.mxu1 %v5526_v7  ;;  %v6867_v7 = vld [vmem:[#allocation7_spill] sm:$0xff] }
 0x1f2   : > { %4549 = vmatprep.subr.bf16.mxu1 %v5538_v9  ;;  %4567 = vmatprep.subr.bf16.mxu0 %v5684_v35  ;;  %v6868_v9 = vld [vmem:[#allocation11_spill] sm:$0xff] }
 0x1f4   : > { %1448 = vmatmul.mubr.bf16.vlgmr.msra.gmra.mrb[20].mxu0 %v1391_v25  ;;  %v5285_v25 = vld [vmem:[%s6819_s1 + $0x40] sm:$0xff]  }
 0x1f5   : > { %4550 = vmatpush3.bf16.msra.mxu1 %v5550_v11  ;;  %4568 = vmatpush3.bf16.msra.mxu0 %v5696_v45  ;;  %v6869_v11 = vld [vmem:[#allocation8_spill] sm:$0xff] }
 0x1f6   : > { %4551 = vmatprep.subr.bf16.mxu1 %v5562_v13  ;;  %4569 = vmatprep.subr.bf16.mxu0 %v5701_v46  ;;  %v6870_v13 = vld [vmem:[#allocation12_spill] sm:$0xff] }
 0x1f7   : > { %1527 = vmatprep.mubr.bf16.mxu0 %v1408_v12  ;;  %v5292_v12 = vld [vmem:[%s6819_s1 + $0x8] sm:$0xff]  }
 0x1f9   : > { %4552 = vmatpush3.bf16.msra.mxu1 %v5574_v15  ;;  %4570 = vmatpush3.bf16.msra.mxu0 %v5708_v47  ;;  %v6872_v15 = vld [vmem:[#allocation13_spill] sm:$0xff] }
 0x1fa   : > { %4553 = vmatprep.subr.bf16.mxu1 %v5586_v17  ;;  %4571 = vmatprep.subr.bf16.mxu0 %v5715_v48  ;;  %v6874_v17 = vld [vmem:[#allocation15_spill] sm:$0xff] }
 0x1fd   : > { %4554 = vmatpush3.bf16.msra.mxu1 %v5599_v19  ;;  %4572 = vmatpush3.bf16.msra.mxu0 %v5724_v51  ;;  %v6876_v19 = vld [vmem:[#allocation17_spill] sm:$0xff] }
 0x1fe   : > { %4555 = vmatprep.subr.bf16.mxu1 %v5611_v21  ;;  %4573 = vmatprep.subr.bf16.mxu0 %v5729_v52  ;;  %v4204_v21 = vcombine.high %v1536_v20, %v1536_v20  ;;  %v5293_v20 = vld [vmem:[%s6819_s1 + $0x90] sm:$0xff]  }
 0x201   : > { %4556 = vmatpush3.bf16.msra.mxu1 %v5624_v23  ;;  %4574 = vmatpush3.bf16.msra.mxu0 %v5737_v55  ;;  %v1546_v23 = vsel %vm998_vm0, %v4203_v22, 0  ;;  %v5295_v22 = vld [vmem:[%s6819_s1 + $0xd8] sm:$0xff]  }
 0x202   : > { %4557 = vmatprep.subr.bf16.mxu1 %v6865_v3  ;;  %4575 = vmatprep.subr.bf16.mxu0 %v6866_v5 }
 0x205   : > { %4558 = vmatpush3.bf16.msra.mxu1 %v6867_v7  ;;  %4576 = vmatpush3.bf16.msra.mxu0 %v6868_v9 }
 0x206   : > { %4559 = vmatprep.subr.bf16.mxu1 %v6869_v11  ;;  %4577 = vmatprep.subr.bf16.mxu0 %v6870_v13 }
 0x209   : > { %4560 = vmatpush3.bf16.msra.mxu1 %v6871_v14  ;;  %4578 = vmatpush3.bf16.msra.mxu0 %v6872_v15 }
 0x20a   : > { %4579 = vmatprep.subr.bf16.mxu0 %v6873_v16  ;;  %4207 = vmatprep.subr.msk.bf16.mxu1 %vm998_vm0, %v4204_v21 }
 0x20c   : > { %1488 = vmatmul.mubr.bf16.vlgmr.msra.gmra.mrb[20].mxu1 %v1398_v6  ;;  %v1759_v6 = vcombine.high %v5973_v41, %v5973_v41 }
 0x20d   : > { %4580 = vmatpush3.bf16.msra.mxu0 %v6874_v17  ;;  %1632 = vmatprep.mubr.bf16.mxu1 %v6864_v37 }
 0x20e   : > { %4581 = vmatprep.subr.bf16.mxu0 %v6875_v18  ;;  %1601 = vmatpush1.bf16.msra.mxu1 %v1546_v23 }
 0x20f   : > { %4211 = vmatprep.subr.msk.bf16.mxu1 %vm998_vm0, %v4204_v21 }
 0x211   : > { %4582 = vmatpush3.bf16.msra.mxu0 %v6876_v19 }
 0x212   : > { %4205 = vmatprep.subr.msk.bf16.mxu0 %vm998_vm0, %v4204_v21 }
 0x214   : > { %1528 = vmatmul.mubr.bf16.vlgmr.msra.gmra.mrb[24].mxu0 %v4202_v1  ;;  %v5291_v1 = vld [vmem:[%s6819_s1 + $0xd0] sm:$0xff]  }
 0x215   : > { %1583 = vmatprep.mubr.bf16.mxu0 %v6864_v37  ;;  %1552 = vmatpush1.bf16.msra.mxu0 %v1546_v23 }
 0x216   : > { %4209 = vmatprep.subr.msk.bf16.mxu0 %vm998_vm0, %v4204_v21  ;;  %v5294_v21 = vld [vmem:[%s6819_s1 + $0x50] sm:$0xff]  }
 0x2c7   : > { %v4539_v24 = vpop.f32.mrb[20].mxu0 }
 0x2c8   : > { %v4540_v43 = vpop.f32.mrb[21].mxu0 }
 0x2c9   : > { %v4541_v49 = vadd.f32 %v4540_v43, %v4539_v24  ;;  %v4542_v54 = vpop.f32.mrb[22].mxu0  ;;  %v5297_v24 = vld [vmem:[%s6819_s1 + $0x98] sm:$0xff]  }
 0x2ca   : > { %v4543_v42 = vpop.f32.mrb[23].mxu0  ;;  %v5298_v43 = vld [vmem:[%s6819_s1 + $0x58] sm:$0xff]  }
 0x2cb   : > { %v5300_v54 = vld [vmem:[%s6819_s1 + $0x18] sm:$0xff]   ;;  %v5301_v42 = vld [vmem:[%s6819_s1 + $0xa0] sm:$0xff]  }
 0x2df   : > { %v4561_v44 = vpop.f32.mrb[20].mxu1 }
 0x2e0   : > { %v4562_v56 = vpop.f32.mrb[21].mxu1 }
 0x2e1   : > { %v4563_v33 = vadd.f32 %v4562_v56, %v4561_v44  ;;  %v4564_v34 = vpop.f32.mrb[22].mxu1  ;;  %v5302_v44 = vld [vmem:[%s6819_s1 + $0x60] sm:$0xff]   ;;  %v5303_v56 = vld [vmem:[%s6819_s1 + $0xe8] sm:$0xff]  }
 0x2e2   : > { %v4565_v62 = vpop.f32.mrb[23].mxu1  ;;  %v5305_v34 = vld [vmem:[%s6819_s1 + $0xa8] sm:$0xff]  }
 0x2e3   : > { %v1490_v61 = vadd.f32 %v4563_v33, %v4541_v49  ;;  %v5299_v49 = vld [vmem:[%s6819_s1 + $0xe0] sm:$0xff]   ;;  %v5306_v62 = vld [vmem:[%s6819_s1 + $0x68] sm:$0xff]  }
 0x2e4   : > { %v5304_v33 = vld [vmem:[%s6819_s1 + $0x20] sm:$0xff]  }
 0x2e7   : > { %v4583_v59 = vpop.f32.mrb[24].mxu0 }
 0x2e8   : > { %v4584_v30 = vpop.f32.mrb[25].mxu0 }
 0x2e9   : > { %v4585_v58 = vadd.f32 %v4584_v30, %v4583_v59  ;;  %v4586_v27 = vpop.f32.mrb[26].mxu0  ;;  %v5308_v59 = vld [vmem:[%s6819_s1 + $0x70] sm:$0xff]  }
 0x2ea   : > { %v4587_v60 = vpop.f32.mrb[27].mxu0 }
 0x2eb   : > { %v1530_v57 = vadd.f32 %v4585_v58, %v1490_v61  ;;  %v5307_v61 = vld [vmem:[%s6819_s1 + $0x28] sm:$0xff]  }
 0x2ec   : > { %v5032_v60 = vld [vmem:[%s6821_s3 + $0x8] sm:$0xff]  }
 0x2ed   : > { %v1535_v63 = vpack.c.bf16 %v1530_v57, %v1530_v57  ;;  %v5033_v57 = vld [vmem:[%s6821_s3 + $0x18] sm:$0xff]  }
 0x2ef   : > { %1691 = vrot.lane.b32.xlu1 %v1535_v63, %s5393_s12  ;;  %1595 = vrot.lane.b32.xlu0 %v1535_v63, %s5392_s10 }
 0x2f0   : > { %4206 = vmatmul.mubr.msk.bf16.vlgmr.msra.gmra.mrb[12].mxu0 %vm994_vm1, %v1535_v63 }
 0x2f1   : > { %1649 = vmatpush1.bf16.msra.mxu0 %v1546_v23  ;;  %1680 = vmatprep.mubr.bf16.mxu0 %v6864_v37 }
 0x2f2   : > { %4611 = vmatprep.subr.bf16.mxu0 %v5284_v28  ;;  %v5035_v28 = vld [vmem:[%s6821_s3 + $0x38] sm:$0xff]  }
 0x2f3   : > { %1643 = vrot.lane.b32.xlu0 %v1535_v63, %s5391_s9  ;;  %v5034_v63 = vld [vmem:[%s6821_s3 + $0x28] sm:$0xff]  }
 0x361   : > { %v1596_v53 = vpop.permute.xlu0 %1595  ;;  %v1692_v4 = vpop.permute.xlu1 %1691 }
 0x362   : > { %4208 = vmatmul.mubr.msk.bf16.vlgmr.msra.gmra.mrb[12].mxu1 %vm994_vm1, %v1596_v53  ;;  %v5039_v53 = vld [vmem:[%s6821_s3] sm:$0xff]  }
 0x363   : > { %1697 = vmatpush1.bf16.msra.mxu1 %v1546_v23  ;;  %1728 = vmatprep.mubr.bf16.mxu1 %v6864_v37  ;;  %v5296_v23 = vld [vmem:[%s6819_s1 + $0x10] sm:$0xff]  }
 0x364   : > { %4589 = vmatprep.subr.bf16.mxu1 %v5285_v25  ;;  %v5042_v25 = vld [vmem:[%s6821_s3 + $0x10] sm:$0xff]  }
 0x365   : > { %v1644_v39 = vpop.permute.xlu0 %1643 }
 0x366   : > { %4210 = vmatmul.mubr.msk.bf16.vlgmr.msra.gmra.mrb[16].mxu0 %vm994_vm1, %v1644_v39  ;;  %v5043_v39 = vld [vmem:[%s6821_s3 + $0x10] sm:$0xff]  }
 0x367   : > { %4612 = vmatpush3.bf16.msra.mxu0 %v5286_v0  ;;  %1847 = vmatprep.mubr.bf16.mxu0 %v1760_v38  ;;  %v5040_v38 = vld [vmem:[%s6821_s3 + $0x8] sm:$0xff]   ;;  %v5047_v0 = vld [vmem:[%s6821_s3 + $0x20] sm:$0xff]  }
 0x368   : > { %4613 = vmatprep.subr.bf16.mxu0 %v5287_v2  ;;  %v5048_v2 = vld [vmem:[%s6821_s3 + $0x20] sm:$0xff]  }
 0x36a   : > { %4212 = vmatmul.mubr.msk.bf16.vlgmr.msra.gmra.mrb[16].mxu1 %vm994_vm1, %v1692_v4 }
 0x36b   : > { %4590 = vmatpush3.bf16.msra.mxu1 %v5288_v40  ;;  %4614 = vmatpush3.bf16.msra.mxu0 %v5289_v8  ;;  %v5050_v40 = vld [vmem:[%s6821_s3 + $0x28] sm:$0xff]  }
 0x36c   : > { %4591 = vmatprep.subr.bf16.mxu1 %v5290_v10  ;;  %4615 = vmatprep.subr.bf16.mxu0 %v5291_v1  ;;  %v5052_v10 = vld [vmem:[%s6821_s3 + $0x30] sm:$0xff]  }
 0x36d   : > { %1807 = vmatprep.mubr.bf16.mxu1 %v1759_v6  ;;  %v5053_v1 = vld [vmem:[%s6821_s3 + $0x30] sm:$0xff]  }
 0x36f   : > { %4592 = vmatpush3.bf16.msra.mxu1 %v5292_v12  ;;  %4616 = vmatpush3.bf16.msra.mxu0 %v5293_v20  ;;  %v5055_v12 = vld [vmem:[%s6821_s3 + $0x38] sm:$0xff]   ;;  %v5057_v20 = vld [vmem:[%s6821_s3 + $0x40] sm:$0xff]  }
 0x370   : > { %4593 = vmatprep.subr.bf16.mxu1 %v5294_v21  ;;  %4617 = vmatprep.subr.bf16.mxu0 %v5295_v22  ;;  %v5058_v21 = vld [vmem:[%s6821_s3 + $0x40] sm:$0xff]   ;;  %v5060_v22 = vld [vmem:[%s6821_s3 + $0x48] sm:$0xff]  }
 0x373   : > { %4594 = vmatpush3.bf16.msra.mxu1 %v5296_v23  ;;  %4618 = vmatpush3.bf16.msra.mxu0 %v5297_v24  ;;  %v5062_v23 = vld [vmem:[%s6821_s3 + $0x50] sm:$0xff]  }
 0x374   : > { %4595 = vmatprep.subr.bf16.mxu1 %v5298_v43  ;;  %4619 = vmatprep.subr.bf16.mxu0 %v5299_v49  ;;  %v5063_v24 = vld [vmem:[%s6821_s3 + $0x50] sm:$0xff]   ;;  %v5065_v43 = vld [vmem:[%s6821_s3 + $0x58] sm:$0xff]   ;;  %v5067_v49 = vld [vmem:[%s6821_s3 + $0x60] ss:$0 sps:$4 sm:$0xff]  }
 0x377   : > { %4596 = vmatpush3.bf16.msra.mxu1 %v5300_v54  ;;  %4620 = vmatpush3.bf16.msra.mxu0 %v5301_v42  ;;  %v5068_v54 = vld [vmem:[%s6821_s3 + $0x60] ss:$0 sps:$4 sm:$0xff]  }
 0x378   : > { %4597 = vmatprep.subr.bf16.mxu1 %v5302_v44  ;;  %4621 = vmatprep.subr.bf16.mxu0 %v5303_v56  ;;  %v5070_v42 = vld [vmem:[%s6821_s3] sm:$0xff]   ;;  %v5072_v44 = vld [vmem:[%s6821_s3 + $0x8] sm:$0xff]  }
 0x37b   : > { %4598 = vmatpush3.bf16.msra.mxu1 %v5304_v33  ;;  %4622 = vmatpush3.bf16.msra.mxu0 %v5305_v34  ;;  %v5073_v33 = vld [vmem:[%s6821_s3 + $0x10] sm:$0xff]  }
 0x37c   : > { %4599 = vmatprep.subr.bf16.mxu1 %v5306_v62  ;;  %4623 = vmatprep.subr.bf16.mxu0 %v6865_v3  ;;  %v4215_v3 = vld.sshfl [vmem:[%s5665_s11 + $0x2c] sm:$0x33 pattern:$0x76325410]  ;;  %s6772_s11 = scalar_lea.sflag [#allocation4], %s258_s25 }
 0x37d   : > { %v1768_v30 = vcombine.high %v4215_v3, %v4215_v3 }
 0x37f   : > { %4600 = vmatpush3.bf16.msra.mxu1 %v5307_v61  ;;  %4624 = vmatpush3.bf16.msra.mxu0 %v6867_v7 }
 0x380   : > { %4601 = vmatprep.subr.bf16.mxu1 %v5308_v59  ;;  %4625 = vmatprep.subr.bf16.mxu0 %v6869_v11 }
 0x383   : > { %4602 = vmatpush3.bf16.msra.mxu1 %v5642_v26  ;;  %4626 = vmatpush3.bf16.msra.mxu0 %v6871_v14  ;;  %v1896_v26 = vld [vmem:[%s6820_s2 + $0x8] sm:$0xcc] }
 0x384   : > { %4603 = vmatprep.subr.bf16.mxu1 %v5654_v29  ;;  %v4217_v29 = vcombine.high %v1896_v26, %v1896_v26 }
 0x386   : > { %1848 = vmatmul.mubr.bf16.vlgmr.msra.gmra.mrb[28].mxu0 %v5963_v32  ;;  %v5038_v32 = vld [vmem:[%s6821_s3] sm:$0xff]  }
 0x387   : > { %4604 = vmatpush3.bf16.msra.mxu1 %v5671_v31  ;;  %1945 = vmatprep.mubr.bf16.mxu0 %v6864_v37  ;;  %v4216_v31 = vcombine.low %v1896_v26, %v1896_v26 }
 0x388   : > { %4633 = vmatprep.subr.bf16.mxu1 %v5684_v35  ;;  %v1903_v35 = vrot.slane %v4217_v29, 2  ;;  %v5074_v29 = vld [vmem:[%s6821_s3 + $0x18] sm:$0xff]  }
 0x38a   : > { %1808 = vmatmul.mubr.bf16.vlgmr.msra.gmra.mrb[24].mxu1 %v5973_v41  ;;  %4218 = vmatprep.subr.msk.bf16.mxu0 %vm998_vm0, %v1903_v35  ;;  %v5045_v41 = vld [vmem:[%s6821_s3 + $0x18] sm:$0xff]  }
 0x38b   : > { %4634 = vmatpush3.bf16.msra.mxu1 %v5696_v45  ;;  %1887 = vmatprep.mubr.bf16.mxu1 %v1768_v30  ;;  %v1902_v45 = vrot.slane %v4216_v31, 2 }
 0x38c   : > { %4635 = vmatprep.subr.bf16.mxu1 %v5701_v46 }
 0x38d   : > { %v1908_v46 = vsel %vm998_vm0, %v1902_v45, 0  ;;  %v5075_v45 = vld [vmem:[%s6821_s3 + $0x20] sm:$0xff]  }
 0x38e   : > { %1914 = vmatpush1.bf16.msra.mxu0 %v1908_v46 }
 0x38f   : > { %4636 = vmatpush3.bf16.msra.mxu1 %v5708_v47  ;;  %4222 = vmatprep.subr.msk.bf16.mxu0 %vm998_vm0, %v1903_v35 }
 0x390   : > { %4637 = vmatprep.subr.bf16.mxu1 %v5715_v48 }
 0x393   : > { %4638 = vmatpush3.bf16.msra.mxu1 %v5724_v51 }
 0x394   : > { %4639 = vmatprep.subr.bf16.mxu1 %v5729_v52 }
 0x397   : > { %4640 = vmatpush3.bf16.msra.mxu1 %v5737_v55 }
 0x398   : > { %4641 = vmatprep.subr.bf16.mxu1 %v6866_v5 }
 0x39b   : > { %4642 = vmatpush3.bf16.msra.mxu1 %v6868_v9 }
 0x39c   : > { %4643 = vmatprep.subr.bf16.mxu1 %v6870_v13 }
 0x39f   : > { %4644 = vmatpush3.bf16.msra.mxu1 %v6872_v15 }
 0x3a0   : > { %4645 = vmatprep.subr.bf16.mxu1 %v6873_v16 }
 0x3a3   : > { %4646 = vmatpush3.bf16.msra.mxu1 %v6874_v17 }
 0x3a4   : > { %4647 = vmatprep.subr.bf16.mxu1 %v6875_v18 }
 0x3a7   : > { %4648 = vmatpush3.bf16.msra.mxu1 %v6876_v19 }
 0x3a8   : > { %4220 = vmatprep.subr.msk.bf16.mxu1 %vm998_vm0, %v1903_v35 }
 0x3aa   : > { %1888 = vmatmul.mubr.bf16.vlgmr.msra.gmra.mrb[28].mxu1 %v4215_v3 }
 0x3ab   : > { %1994 = vmatprep.mubr.bf16.mxu1 %v6864_v37  ;;  %1963 = vmatpush1.bf16.msra.mxu1 %v1908_v46 }
 0x3ac   : > { %4224 = vmatprep.subr.msk.bf16.mxu1 %vm998_vm0, %v1903_v35  ;;  %v5041_v35 = vld [vmem:[%s6821_s3] sm:$0xff]  }
 0x459   : > { %v4627_v47 = vpop.f32.mrb[28].mxu0 }
 0x45a   : > { %v4628_v48 = vpop.f32.mrb[29].mxu0 }
 0x45b   : > { %v4629_v51 = vadd.f32 %v4628_v48, %v4627_v47  ;;  %v4630_v52 = vpop.f32.mrb[30].mxu0  ;;  %v5076_v47 = vld [vmem:[%s6821_s3 + $0x28] sm:$0xff]   ;;  %v5046_v48 = vld [vmem:[%s6821_s3 + $0x10] sm:$0xff]  }
 0x45c   : > { %v4631_v55 = vpop.f32.mrb[31].mxu0  ;;  %v5049_v52 = vld [vmem:[%s6821_s3 + $0x18] sm:$0xff]  }
 0x45d   : > { %v4605_v5 = vpop.f32.mrb[24].mxu1  ;;  %v5078_v55 = vld [vmem:[%s6821_s3 + $0x38] sm:$0xff]  }
 0x45e   : > { %v4606_v7 = vpop.f32.mrb[25].mxu1 }
 0x45f   : > { %v4607_v9 = vadd.f32 %v4606_v7, %v4605_v5  ;;  %v4608_v11 = vpop.f32.mrb[26].mxu1  ;;  %v5051_v5 = vld [vmem:[%s6821_s3 + $0x20] sm:$0xff]  }
 0x460   : > { %v4609_v13 = vpop.f32.mrb[27].mxu1  ;;  %v5079_v7 = vld [vmem:[%s6821_s3 + $0x40] sm:$0xff]   ;;  %v5080_v11 = vld [vmem:[%s6821_s3 + $0x48] sm:$0xff]  }
 0x461   : > { %v1850_v14 = vadd.f32 %v4629_v51, %v4607_v9  ;;  %v5077_v51 = vld [vmem:[%s6821_s3 + $0x30] sm:$0xff]   ;;  %v5054_v9 = vld [vmem:[%s6821_s3 + $0x28] sm:$0xff]  }
 0x462   : > { %v5056_v13 = vld [vmem:[%s6821_s3 + $0x30] sm:$0xff]  }
 0x47d   : > { %v4649_v15 = vpop.f32.mrb[28].mxu1 }
 0x47e   : > { %v4650_v16 = vpop.f32.mrb[29].mxu1 }
 0x47f   : > { %v4651_v17 = vadd.f32 %v4650_v16, %v4649_v15  ;;  %v4652_v18 = vpop.f32.mrb[30].mxu1  ;;  %v5059_v15 = vld [vmem:[%s6821_s3 + $0x38] sm:$0xff]  }
 0x480   : > { %v4653_v19 = vpop.f32.mrb[31].mxu1  ;;  %v5082_v16 = vld [vmem:[%s6821_s3 + $0x58] sm:$0xff]   ;;  %v5083_v18 = vld [vmem:[%s6821_s3 + $0x60] ss:$0 sps:$4 sm:$0xff]  }
 0x481   : > { %v1890_v58 = vadd.f32 %v4651_v17, %v1850_v14  ;;  %v5081_v14 = vld [vmem:[%s6821_s3 + $0x50] sm:$0xff]   ;;  %v5061_v17 = vld [vmem:[%s6821_s3 + $0x40] sm:$0xff]   ;;  %v5064_v19 = vld [vmem:[%s6821_s3 + $0x48] sm:$0xff]  }
 0x483   : > { %v1895_v27 = vpack.c.bf16 %v1890_v58, %v1890_v58 }
 0x485   : > { %1957 = vrot.lane.b32.xlu0 %v1895_v27, %s5392_s10  ;;  %2005 = vrot.lane.b32.xlu1 %v1895_v27, %s5391_s9 }
 0x486   : > { %4219 = vmatmul.mubr.msk.bf16.vlgmr.msra.gmra.mrb[12].mxu0 %vm994_vm1, %v1895_v27 }
 0x487   : > { %2011 = vmatpush1.bf16.msra.mxu0 %v1908_v46  ;;  %2042 = vmatprep.mubr.bf16.mxu0 %v6864_v37 }
 0x489   : > { %2053 = vrot.lane.b32.xlu1 %v1895_v27, %s5393_s12  ;;  %3005 = vrot.lane.b32.xlu0 %v5038_v32, %s5391_s9  ;;  %v5066_v27 = vld [vmem:[%s6821_s3 + $0x50] sm:$0xff]  }
 0x48d   : > { %3007 = vrot.lane.b32.xlu1 %v5032_v60, %s5391_s9  ;;  %3009 = vrot.lane.b32.xlu0 %v5042_v25, %s5391_s9 }
 0x491   : > { %3011 = vrot.lane.b32.xlu1 %v5033_v57, %s5391_s9  ;;  %3013 = vrot.lane.b32.xlu0 %v5047_v0, %s5391_s9  ;;  %v5069_v57 = vld [vmem:[%s6821_s3 + $0x58] sm:$0xff]  }
 0x495   : > { %3015 = vrot.lane.b32.xlu1 %v5034_v63, %s5391_s9  ;;  %3017 = vrot.lane.b32.xlu0 %v5052_v10, %s5391_s9 }
 0x499   : > { %3019 = vrot.lane.b32.xlu1 %v5035_v28, %s5391_s9  ;;  %3021 = vrot.lane.b32.xlu0 %v5057_v20, %s5391_s9 }
 0x49d   : > { %3023 = vrot.lane.b32.xlu1 %v5036_v50, %s5391_s9  ;;  %3025 = vrot.lane.b32.xlu0 %v5062_v23, %s5391_s9  ;;  %v5071_v50 = vld [vmem:[%s6821_s3 + $0x60] ss:$0 sps:$4 sm:$0xff]  }
 0x4a1   : > { %3027 = vrot.lane.b32.xlu1 %v5037_v36, %s5391_s9  ;;  %3029 = vrot.lane.b32.xlu0 %v5067_v49, %s5391_s9 }
 0x4a5   : > { %2629 = vrot.lane.b32.xlu1 %v5039_v53, %s5392_s10  ;;  %3381 = vrot.lane.b32.xlu0 %v5070_v42, %s5393_s12 }
 0x4a9   : > { %2631 = vrot.lane.b32.xlu1 %v5040_v38, %s5392_s10  ;;  %3383 = vrot.lane.b32.xlu0 %v5072_v44, %s5393_s12 }
 0x4ad   : > { %2633 = vrot.lane.b32.xlu1 %v5043_v39, %s5392_s10  ;;  %3385 = vrot.lane.b32.xlu0 %v5073_v33, %s5393_s12 }
 0x4b1   : > { %2635 = vrot.lane.b32.xlu1 %v5045_v41, %s5392_s10  ;;  %3387 = vrot.lane.b32.xlu0 %v5074_v29, %s5393_s12 }
 0x4b5   : > { %2637 = vrot.lane.b32.xlu1 %v5048_v2, %s5392_s10  ;;  %3389 = vrot.lane.b32.xlu0 %v5075_v45, %s5393_s12 }
 0x4b9   : > { %2639 = vrot.lane.b32.xlu1 %v5050_v40, %s5392_s10  ;;  %3391 = vrot.lane.b32.xlu0 %v5076_v47, %s5393_s12 }
 0x4bd   : > { %2641 = vrot.lane.b32.xlu1 %v5053_v1, %s5392_s10  ;;  %3393 = vrot.lane.b32.xlu0 %v5077_v51, %s5393_s12 }
 0x4c1   : > { %2643 = vrot.lane.b32.xlu1 %v5055_v12, %s5392_s10  ;;  %3395 = vrot.lane.b32.xlu0 %v5078_v55, %s5393_s12 }
 0x4c5   : > { %2645 = vrot.lane.b32.xlu1 %v5058_v21, %s5392_s10  ;;  %3397 = vrot.lane.b32.xlu0 %v5079_v7, %s5393_s12 }
 0x4c9   : > { %2647 = vrot.lane.b32.xlu1 %v5060_v22, %s5392_s10  ;;  %3399 = vrot.lane.b32.xlu0 %v5080_v11, %s5393_s12 }
 0x4cd   : > { %2649 = vrot.lane.b32.xlu1 %v5063_v24, %s5392_s10  ;;  %3401 = vrot.lane.b32.xlu0 %v5081_v14, %s5393_s12 }
 0x4d1   : > { %2651 = vrot.lane.b32.xlu1 %v5065_v43, %s5392_s10  ;;  %3403 = vrot.lane.b32.xlu0 %v5082_v16, %s5393_s12 }
 0x4d5   : > { %2653 = vrot.lane.b32.xlu1 %v5068_v54, %s5392_s10  ;;  %3405 = vrot.lane.b32.xlu0 %v5083_v18, %s5393_s12  ;;  %s6765_s12 = scalar_lea.hbm %s6823_s5, %s4909_s17 }
 0x4f7   : > { %v1958_v4 = vpop.permute.xlu0 %1957  ;;  %v2006_v6 = vpop.permute.xlu1 %2005 }
 0x4f8   : > { %4221 = vmatmul.mubr.msk.bf16.vlgmr.msra.gmra.mrb[12].mxu1 %vm994_vm1, %v1958_v4  ;;  %4223 = vmatmul.mubr.msk.bf16.vlgmr.msra.gmra.mrb[16].mxu0 %vm994_vm1, %v2006_v6 }
 0x4f9   : > { %2059 = vmatpush1.bf16.msra.mxu1 %v1908_v46  ;;  %2090 = vmatprep.mubr.bf16.mxu1 %v6864_v37  ;;  %v5044_v46 = vld [vmem:[%s6821_s3 + $0x8] sm:$0xff]  }
 0x4fa   : > { %3108 = vmatprep.mubr.bf16.mxu0 %v6864_v37 }
 0x4fb   : > { %v2054_v8 = vpop.permute.xlu1 %2053  ;;  %v3006_v24 = vpop.permute.xlu0 %3005 }
 0x4ff   : > { %v3008_v58 = vpop.permute.xlu1 %3007 }
 0x500   : > { %4225 = vmatmul.mubr.msk.bf16.vlgmr.msra.gmra.mrb[16].mxu1 %vm994_vm1, %v2054_v8 }
 0x501   : > { %2356 = vmatprep.mubr.bf16.mxu1 %v6864_v37 }
 0x503   : > { %v6306_v60 = vpop.permute.xlu1 %3011 }
 0x507   : > { %v6313_v63 = vpop.permute.xlu1 %3015 }
 0x50b   : > { %v6317_v28 = vpop.permute.xlu1 %3019 }
 0x50f   : > { %v6323_v36 = vpop.permute.xlu1 %3023 }
 0x513   : > { %v6326_v32 = vpop.permute.xlu1 %3027 }
 0x517   : > { %v2630_v43 = vpop.permute.xlu1 %2629 }
 0x559   : > { %v1947_v56 = vpop.f32.mrb[12].mxu0 }
 0x55a   : > { %v1949_v34 = vpop.f32.mrb[13].mxu0 }
 0x55b   : > { %v2104_v62 = vcombine.low %v1947_v56, %v1949_v34  ;;  %v4387_v61 = vcombine.low %v1949_v34, %v1949_v34  ;;  %v1951_v59 = vpop.f32.mrb[14].mxu0 }
 0x55c   : > { %v1952_v3 = vpop.f32.mrb[15].mxu0  ;;  %v2632_v59 = vpop.permute.xlu1 %2631 }
 0x55d   : > { %v2214_v30 = vpack.c.bf16 %v2104_v62, %v2104_v62  ;;  %v2215_v26 = vpack.c.bf16 %v4387_v61, %v4387_v61  ;;  %v3010_v3 = vpop.permute.xlu0 %3009 }
 0x55f   : > { %4239 = vmatprep.subr.msk.bf16.mxu1 %vm998_vm0, %v2215_v26  ;;  %v2319_v31 = vsel %vm998_vm0, %v2214_v30, 0 }
 0x560   : > { %2325 = vmatpush1.bf16.msra.mxu1 %v2319_v31  ;;  %v2634_v30 = vpop.permute.xlu1 %2633 }
 0x561   : > { %v3014_v29 = vpop.permute.xlu0 %3013 }
 0x563   : > { %4240 = vmatmul.mubr.msk.bf16.vlgmr.msra.gmra.mrb[32].mxu1 %vm994_vm1, %v5041_v35 }
 0x564   : > { %2366 = vmatprep.mubr.bf16.mxu1 %v6864_v37  ;;  %v2636_v26 = vpop.permute.xlu1 %2635 }
 0x565   : > { %v3018_v45 = vpop.permute.xlu0 %3017 }
 0x568   : > { %v2638_v31 = vpop.permute.xlu1 %2637 }
 0x56b   : > { %4241 = vmatmul.mubr.msk.bf16.gmra.mrb[36].mxu1 %vm994_vm1, %v5044_v46 }
 0x56c   : > { %2376 = vmatprep.mubr.bf16.mxu1 %v6864_v37  ;;  %v2640_v35 = vpop.permute.xlu1 %2639 }
 0x570   : > { %v2642_v46 = vpop.permute.xlu1 %2641 }
 0x573   : > { %4242 = vmatmul.mubr.msk.bf16.gmra.mrb[40].mxu1 %vm994_vm1, %v5046_v48  ;;  %v3022_v48 = vpop.permute.xlu0 %3021 }
 0x574   : > { %2386 = vmatprep.mubr.bf16.mxu1 %v6864_v37  ;;  %v2644_v47 = vpop.permute.xlu1 %2643 }
 0x577   : > { %v3026_v55 = vpop.permute.xlu0 %3025 }
 0x578   : > { %v2646_v51 = vpop.permute.xlu1 %2645 }
 0x57b   : > { %4243 = vmatmul.mubr.msk.bf16.gmra.mrb[44].mxu1 %vm994_vm1, %v5049_v52 }
 0x57c   : > { %2396 = vmatprep.mubr.bf16.mxu1 %v6864_v37  ;;  %v2648_v52 = vpop.permute.xlu1 %2647 }
 0x583   : > { %4244 = vmatmul.mubr.msk.bf16.gmra.mrb[48].mxu1 %vm994_vm1, %v5051_v5  ;;  %v2650_v5 = vpop.permute.xlu1 %2649 }
 0x584   : > { %2406 = vmatprep.mubr.bf16.mxu1 %v6864_v37 }
 0x587   : > { %v2652_v7 = vpop.permute.xlu1 %2651 }
 0x58b   : > { %4245 = vmatmul.mubr.msk.bf16.gmra.mrb[52].mxu1 %vm994_vm1, %v5054_v9  ;;  %v3030_v9 = vpop.permute.xlu0 %3029  ;;  %v2654_v11 = vpop.permute.xlu1 %2653 }
 0x58c   : > { %2416 = vmatprep.mubr.bf16.mxu1 %v6864_v37 }
 0x593   : > { %4246 = vmatmul.mubr.msk.bf16.gmra.mrb[56].mxu1 %vm994_vm1, %v5056_v13  ;;  %v3382_v13 = vpop.permute.xlu0 %3381 }
 0x594   : > { %2426 = vmatprep.mubr.bf16.mxu1 %v6864_v37 }
 0x597   : > { %v3384_v14 = vpop.permute.xlu0 %3383 }
 0x59b   : > { %4247 = vmatmul.mubr.msk.bf16.gmra.mrb[60].mxu1 %vm994_vm1, %v5059_v15  ;;  %v3386_v15 = vpop.permute.xlu0 %3385 }
 0x59c   : > { %2436 = vmatprep.mubr.bf16.mxu1 %v6864_v37 }
 0x59f   : > { %v3388_v16 = vpop.permute.xlu0 %3387 }
 0x5a3   : > { %4248 = vmatmul.mubr.msk.bf16.gmra.mrb[64].mxu1 %vm994_vm1, %v5061_v17  ;;  %v3390_v17 = vpop.permute.xlu0 %3389 }
 0x5a4   : > { %2446 = vmatprep.mubr.bf16.mxu1 %v6864_v37 }
 0x5a7   : > { %v3392_v18 = vpop.permute.xlu0 %3391 }
 0x5ab   : > { %4249 = vmatmul.mubr.msk.bf16.gmra.mrb[68].mxu1 %vm994_vm1, %v5064_v19  ;;  %v3394_v19 = vpop.permute.xlu0 %3393 }
 0x5ac   : > { %2456 = vmatprep.mubr.bf16.mxu1 %v6864_v37 }
 0x5b3   : > { %4250 = vmatmul.mubr.msk.bf16.gmra.mrb[72].mxu1 %vm994_vm1, %v5066_v27 }
 0x5b4   : > { %2466 = vmatprep.mubr.bf16.mxu1 %v6864_v37 }
 0x5bb   : > { %4251 = vmatmul.mubr.msk.bf16.gmra.mrb[76].mxu1 %vm994_vm1, %v5069_v57 }
 0x5bc   : > { %2476 = vmatprep.mubr.bf16.mxu1 %v6864_v37 }
 0x5c3   : > { %4252 = vmatmul.mubr.msk.bf16.gmra.mrb[80].mxu1 %vm994_vm1, %v5071_v50 }
 0x5c4   : > { %2732 = vmatprep.mubr.bf16.mxu1 %v6864_v37 }
 0x5cb   : > { %v1996_v53 = vpop.f32.mrb[12].mxu1  ;;  %v2044_v38 = vpop.f32.mrb[16].mxu0 }
 0x5cc   : > { %v1998_v25 = vpop.f32.mrb[13].mxu1  ;;  %v2046_v39 = vpop.f32.mrb[17].mxu0 }
 0x5cd   : > { %v2112_v41 = vcombine.low %v1996_v53, %v1998_v25  ;;  %v4388_v0 = vcombine.low %v1998_v25, %v1998_v25  ;;  %v2120_v2 = vcombine.low %v2044_v38, %v2046_v39  ;;  %v4389_v4 = vcombine.low %v2046_v39, %v2046_v39  ;;  %v2000_v6 = vpop.f32.mrb[14].mxu1  ;;  %v2048_v40 = vpop.f32.mrb[18].mxu0 }
 0x5ce   : > { %v2001_v8 = vpop.f32.mrb[15].mxu1  ;;  %v2049_v10 = vpop.f32.mrb[19].mxu0 }
 0x5cf   : > { %v2564_v1 = vpack.c.bf16 %v2112_v41, %v2112_v41  ;;  %v2565_v12 = vpack.c.bf16 %v4388_v0, %v4388_v0  ;;  %v2940_v20 = vpack.c.bf16 %v2120_v2, %v2120_v2  ;;  %v2941_v21 = vpack.c.bf16 %v4389_v4, %v4389_v4 }
 0x5d1   : > { %4266 = vmatprep.subr.msk.bf16.mxu1 %vm998_vm0, %v2565_v12  ;;  %4293 = vmatprep.subr.msk.bf16.mxu0 %vm998_vm0, %v2941_v21  ;;  %v2695_v22 = vsel %vm998_vm0, %v2564_v1, 0  ;;  %v3071_v23 = vsel %vm998_vm0, %v2940_v20, 0 }
 0x5d2   : > { %2701 = vmatpush1.bf16.msra.mxu1 %v2695_v22  ;;  %3077 = vmatpush1.bf16.msra.mxu0 %v3071_v23 }
 0x5d3   : > { %v2092_v49 = vpop.f32.mrb[16].mxu1 }
 0x5d4   : > { %v2094_v54 = vpop.f32.mrb[17].mxu1 }
 0x5d5   : > { %v2128_v42 = vcombine.low %v2092_v49, %v2094_v54  ;;  %v4390_v44 = vcombine.low %v2094_v54, %v2094_v54  ;;  %v2096_v56 = vpop.f32.mrb[18].mxu1  ;;  %4267 = vmatmul.mubr.msk.bf16.vlgmr.msra.gmra.mrb[32].mxu1 %vm994_vm1, %v2630_v43  ;;  %4294 = vmatmul.mubr.msk.bf16.vlgmr.msra.gmra.mrb[32].mxu0 %vm994_vm1, %v3006_v24 }
 0x5d6   : > { %v2097_v33 = vpop.f32.mrb[19].mxu1  ;;  %2742 = vmatprep.mubr.bf16.mxu1 %v6864_v37  ;;  %3118 = vmatprep.mubr.bf16.mxu0 %v6864_v37 }
 0x5d7   : > { %v3316_v34 = vpack.c.bf16 %v2128_v42, %v2128_v42  ;;  %v3317_v62 = vpack.c.bf16 %v4390_v44, %v4390_v44 }
 0x5d9   : > { %4320 = vmatprep.subr.msk.bf16.mxu0 %vm998_vm0, %v3317_v62  ;;  %v3447_v61 = vsel %vm998_vm0, %v3316_v34, 0 }
 0x5da   : > { %3453 = vmatpush1.bf16.msra.mxu0 %v3447_v61 }
 0x5dd   : > { %4268 = vmatmul.mubr.msk.bf16.gmra.mrb[36].mxu1 %vm994_vm1, %v2632_v59  ;;  %4295 = vmatmul.mubr.msk.bf16.gmra.mrb[36].mxu0 %vm994_vm1, %v3008_v58  ;;  %v3396_v58 = vpop.permute.xlu0 %3395 }
 0x5de   : > { %2752 = vmatprep.mubr.bf16.mxu1 %v6864_v37  ;;  %3128 = vmatprep.mubr.bf16.mxu0 %v6864_v37 }
 0x5e1   : > { %v3398_v27 = vpop.permute.xlu0 %3397 }
 0x5e5   : > { %4269 = vmatmul.mubr.msk.bf16.gmra.mrb[40].mxu1 %vm994_vm1, %v2634_v30  ;;  %4296 = vmatmul.mubr.msk.bf16.gmra.mrb[40].mxu0 %vm994_vm1, %v3010_v3 }
 0x5e6   : > { %2762 = vmatprep.mubr.bf16.mxu1 %v6864_v37  ;;  %3138 = vmatprep.mubr.bf16.mxu0 %v6864_v37 }
 0x5ed   : > { %4270 = vmatmul.mubr.msk.bf16.gmra.mrb[44].mxu1 %vm994_vm1, %v2636_v26  ;;  %4297 = vmatmul.mubr.msk.bf16.gmra.mrb[44].mxu0 %vm994_vm1, %v6306_v60  ;;  %v3400_v60 = vpop.permute.xlu0 %3399 }
 0x5ee   : > { %2772 = vmatprep.mubr.bf16.mxu1 %v6864_v37  ;;  %3148 = vmatprep.mubr.bf16.mxu0 %v6864_v37 }
 0x5f1   : > { %v3402_v57 = vpop.permute.xlu0 %3401 }
 0x5f5   : > { %4271 = vmatmul.mubr.msk.bf16.gmra.mrb[48].mxu1 %vm994_vm1, %v2638_v31  ;;  %4298 = vmatmul.mubr.msk.bf16.gmra.mrb[48].mxu0 %vm994_vm1, %v3014_v29 }
 0x5f6   : > { %2782 = vmatprep.mubr.bf16.mxu1 %v6864_v37  ;;  %3158 = vmatprep.mubr.bf16.mxu0 %v6864_v37 }
 0x5fd   : > { %4272 = vmatmul.mubr.msk.bf16.gmra.mrb[52].mxu1 %vm994_vm1, %v2640_v35  ;;  %4299 = vmatmul.mubr.msk.bf16.gmra.mrb[52].mxu0 %vm994_vm1, %v6313_v63  ;;  %v3404_v63 = vpop.permute.xlu0 %3403 }
 0x5fe   : > { %2792 = vmatprep.mubr.bf16.mxu1 %v6864_v37  ;;  %3168 = vmatprep.mubr.bf16.mxu0 %v6864_v37 }
 0x605   : > { %4273 = vmatmul.mubr.msk.bf16.gmra.mrb[56].mxu1 %vm994_vm1, %v2642_v46  ;;  %4300 = vmatmul.mubr.msk.bf16.gmra.mrb[56].mxu0 %vm994_vm1, %v3018_v45 }
 0x606   : > { %2802 = vmatprep.mubr.bf16.mxu1 %v6864_v37  ;;  %3178 = vmatprep.mubr.bf16.mxu0 %v6864_v37 }
 0x60d   : > { %4274 = vmatmul.mubr.msk.bf16.gmra.mrb[60].mxu1 %vm994_vm1, %v2644_v47  ;;  %4301 = vmatmul.mubr.msk.bf16.gmra.mrb[60].mxu0 %vm994_vm1, %v6317_v28  ;;  %v3406_v28 = vpop.permute.xlu0 %3405 }
 0x60e   : > { %2812 = vmatprep.mubr.bf16.mxu1 %v6864_v37  ;;  %3188 = vmatprep.mubr.bf16.mxu0 %v6864_v37 }
 0x615   : > { %4275 = vmatmul.mubr.msk.bf16.gmra.mrb[64].mxu1 %vm994_vm1, %v2646_v51  ;;  %4302 = vmatmul.mubr.msk.bf16.gmra.mrb[64].mxu0 %vm994_vm1, %v3022_v48 }
 0x616   : > { %2822 = vmatprep.mubr.bf16.mxu1 %v6864_v37  ;;  %3198 = vmatprep.mubr.bf16.mxu0 %v6864_v37 }
 0x61d   : > { %4276 = vmatmul.mubr.msk.bf16.gmra.mrb[68].mxu1 %vm994_vm1, %v2648_v52  ;;  %4303 = vmatmul.mubr.msk.bf16.gmra.mrb[68].mxu0 %vm994_vm1, %v6323_v36 }
 0x61e   : > { %2832 = vmatprep.mubr.bf16.mxu1 %v6864_v37  ;;  %3208 = vmatprep.mubr.bf16.mxu0 %v6864_v37 }
 0x625   : > { %4277 = vmatmul.mubr.msk.bf16.gmra.mrb[72].mxu1 %vm994_vm1, %v2650_v5  ;;  %4304 = vmatmul.mubr.msk.bf16.gmra.mrb[72].mxu0 %vm994_vm1, %v3026_v55 }
 0x626   : > { %2842 = vmatprep.mubr.bf16.mxu1 %v6864_v37  ;;  %3218 = vmatprep.mubr.bf16.mxu0 %v6864_v37 }
 0x62d   : > { %4278 = vmatmul.mubr.msk.bf16.gmra.mrb[76].mxu1 %vm994_vm1, %v2652_v7  ;;  %4305 = vmatmul.mubr.msk.bf16.gmra.mrb[76].mxu0 %vm994_vm1, %v6326_v32 }
 0x62e   : > { %2852 = vmatprep.mubr.bf16.mxu1 %v6864_v37  ;;  %3228 = vmatprep.mubr.bf16.mxu0 %v6864_v37 }
 0x635   : > { %4279 = vmatmul.mubr.msk.bf16.gmra.mrb[80].mxu1 %vm994_vm1, %v2654_v11  ;;  %4306 = vmatmul.mubr.msk.bf16.gmra.mrb[80].mxu0 %vm994_vm1, %v3030_v9 }
 0x636   : > { %3484 = vmatprep.mubr.bf16.mxu0 %v6864_v37 }
 0x63d   : > { %4321 = vmatmul.mubr.msk.bf16.vlgmr.msra.gmra.mrb[32].mxu0 %vm994_vm1, %v3382_v13 }
 0x63e   : > { %3494 = vmatprep.mubr.bf16.mxu0 %v6864_v37 }
 0x645   : > { %4322 = vmatmul.mubr.msk.bf16.gmra.mrb[36].mxu0 %vm994_vm1, %v3384_v14  ;;  %v2135_v14 = vld [vmem:[%s6822_s4] sm:$0xff] }
 0x646   : > { %3504 = vmatprep.mubr.bf16.mxu0 %v6864_v37 }
 0x64d   : > { %4323 = vmatmul.mubr.msk.bf16.gmra.mrb[40].mxu0 %vm994_vm1, %v3386_v15  ;;  %v2136_v15 = vld [vmem:[%s6822_s4 + $0x8] sm:$0xff] }
 0x64e   : > { %3514 = vmatprep.mubr.bf16.mxu0 %v6864_v37 }
 0x655   : > { %4324 = vmatmul.mubr.msk.bf16.gmra.mrb[44].mxu0 %vm994_vm1, %v3388_v16  ;;  %v2137_v16 = vld [vmem:[%s6822_s4 + $0x10] sm:$0xff] }
 0x656   : > { %3524 = vmatprep.mubr.bf16.mxu0 %v6864_v37 }
 0x65d   : > { %4325 = vmatmul.mubr.msk.bf16.gmra.mrb[48].mxu0 %vm994_vm1, %v3390_v17 }
 0x65e   : > { %3534 = vmatprep.mubr.bf16.mxu0 %v6864_v37 }
 0x665   : > { %4326 = vmatmul.mubr.msk.bf16.gmra.mrb[52].mxu0 %vm994_vm1, %v3392_v18  ;;  %v2138_v18 = vld [vmem:[%s6822_s4 + $0x18] sm:$0xff] }
 0x666   : > { %3544 = vmatprep.mubr.bf16.mxu0 %v6864_v37 }
 0x66d   : > { %4327 = vmatmul.mubr.msk.bf16.gmra.mrb[56].mxu0 %vm994_vm1, %v3394_v19 }
 0x66e   : > { %3554 = vmatprep.mubr.bf16.mxu0 %v6864_v37 }
 0x675   : > { %4328 = vmatmul.mubr.msk.bf16.gmra.mrb[60].mxu0 %vm994_vm1, %v3396_v58 }
 0x676   : > { %3564 = vmatprep.mubr.bf16.mxu0 %v6864_v37 }
 0x67d   : > { %4329 = vmatmul.mubr.msk.bf16.gmra.mrb[64].mxu0 %vm994_vm1, %v3398_v27 }
 0x67e   : > { %3574 = vmatprep.mubr.bf16.mxu0 %v6864_v37 }
 0x685   : > { %4330 = vmatmul.mubr.msk.bf16.gmra.mrb[68].mxu0 %vm994_vm1, %v3400_v60 }
 0x686   : > { %3584 = vmatprep.mubr.bf16.mxu0 %v6864_v37 }
 0x68d   : > { %4331 = vmatmul.mubr.msk.bf16.gmra.mrb[72].mxu0 %vm994_vm1, %v3402_v57 }
 0x68e   : > { %3594 = vmatprep.mubr.bf16.mxu0 %v6864_v37 }
 0x695   : > { %4332 = vmatmul.mubr.msk.bf16.gmra.mrb[76].mxu0 %vm994_vm1, %v3404_v63 }
 0x696   : > { %3604 = vmatprep.mubr.bf16.mxu0 %v6864_v37 }
 0x69d   : > { %4333 = vmatmul.mubr.msk.bf16.gmra.mrb[80].mxu0 %vm994_vm1, %v3406_v28 }
 0x6a8   : > { %v2734_v50 = vpop.f32.mrb[32].mxu1 }
 0x6a9   : > { %v2736_v36 = vpop.f32.mrb[33].mxu1  ;;  %v4655_v17 = vadd.f32 %v2734_v50, %v2135_v14 }
 0x6aa   : > { %v2738_v32 = vpop.f32.mrb[34].mxu1  ;;  %v4657_v19 = vadd.f32 %v2736_v36, %v2136_v15  ;;  %v2140_v36 = vld [vmem:[%s6822_s4 + $0x28] sm:$0xff] }
 0x6ab   : > { %v2740_v53 = vpop.f32.mrb[35].mxu1  ;;  %v4659_v27 = vadd.f32 %v2738_v32, %v2137_v16 }
 0x6ac   : > { %v4661_v63 = vadd.f32 %v2740_v53, %v2138_v18  ;;  %v2141_v53 = vld [vmem:[%s6822_s4 + $0x30] sm:$0xff] }
 0x6b0   : > { %v6415_v38 = vpop.f32.mrb[36].mxu1 }
 0x6b1   : > { %v6417_v25 = vpop.f32.mrb[37].mxu1 }
 0x6b2   : > { %v6419_v39 = vpop.f32.mrb[38].mxu1 }
 0x6b3   : > { %v6421_v41 = vpop.f32.mrb[39].mxu1 }
 0x6b8   : > { %v6423_v0 = vpop.f32.mrb[40].mxu1 }
 0x6b9   : > { %v6425_v2 = vpop.f32.mrb[41].mxu1 }
 0x6ba   : > { %v6427_v37 = vpop.f32.mrb[42].mxu1 }
 0x6bb   : > { %v6429_v4 = vpop.f32.mrb[43].mxu1 }
 0x6c0   : > { %v6431_v6 = vpop.f32.mrb[44].mxu1 }
 0x6c1   : > { %v6433_v40 = vpop.f32.mrb[45].mxu1 }
 0x6c2   : > { %v6435_v8 = vpop.f32.mrb[46].mxu1 }
 0x6c3   : > { %v6437_v10 = vpop.f32.mrb[47].mxu1 }
 0x6c8   : > { %v6439_v1 = vpop.f32.mrb[48].mxu1 }
 0x6c9   : > { %v6441_v12 = vpop.f32.mrb[49].mxu1 }
 0x6ca   : > { %v6443_v20 = vpop.f32.mrb[50].mxu1 }
 0x6cb   : > { %v6445_v21 = vpop.f32.mrb[51].mxu1 }
 0x6d0   : > { %v6447_v22 = vpop.f32.mrb[52].mxu1 }
 0x6d1   : > { %v6449_v23 = vpop.f32.mrb[53].mxu1 }
 0x6d2   : > { %v6451_v24 = vpop.f32.mrb[54].mxu1 }
 0x6d3   : > { %v6453_v43 = vpop.f32.mrb[55].mxu1 }
 0x6d8   : > { %v6455_v49 = vpop.f32.mrb[56].mxu1 }
 0x6d9   : > { %v6457_v54 = vpop.f32.mrb[57].mxu1 }
 0x6da   : > { %v6459_v42 = vpop.f32.mrb[58].mxu1 }
 0x6db   : > { %v6461_v44 = vpop.f32.mrb[59].mxu1 }
 0x6e0   : > { %v6463_v56 = vpop.f32.mrb[60].mxu1 }
 0x6e1   : > { %v6465_v33 = vpop.f32.mrb[61].mxu1 }
 0x6e2   : > { %v6467_v34 = vpop.f32.mrb[62].mxu1 }
 0x6e3   : > { %v6469_v62 = vpop.f32.mrb[63].mxu1 }
 0x6e8   : > { %v6471_v61 = vpop.f32.mrb[64].mxu1 }
 0x6e9   : > { %v6473_v59 = vpop.f32.mrb[65].mxu1 }
 0x6ea   : > { %v6475_v3 = vpop.f32.mrb[66].mxu1 }
 0x6eb   : > { %v6477_v30 = vpop.f32.mrb[67].mxu1 }
 0x6f0   : > { %v6479_v26 = vpop.f32.mrb[68].mxu1 }
 0x6f1   : > { %v6481_v29 = vpop.f32.mrb[69].mxu1 }
 0x6f2   : > { %v6483_v31 = vpop.f32.mrb[70].mxu1 }
 0x6f3   : > { %v6485_v35 = vpop.f32.mrb[71].mxu1 }
 0x6f8   : > { %v6487_v45 = vpop.f32.mrb[72].mxu1 }
 0x6f9   : > { %v6489_v46 = vpop.f32.mrb[73].mxu1 }
 0x6fa   : > { %v6491_v47 = vpop.f32.mrb[74].mxu1 }
 0x6fb   : > { %v6493_v48 = vpop.f32.mrb[75].mxu1 }
 0x700   : > { %v6495_v51 = vpop.f32.mrb[76].mxu1 }
 0x701   : > { %v6497_v52 = vpop.f32.mrb[77].mxu1 }
 0x702   : > { %v6499_v55 = vpop.f32.mrb[78].mxu1 }
 0x703   : > { %v6501_v5 = vpop.f32.mrb[79].mxu1 }
 0x704   : > { %6877 = vst [vmem:[#allocation6_spill] sm:$0xff] %v6501_v5  ;;  %v2139_v5 = vld [vmem:[%s6822_s4 + $0x20] sm:$0xff] }
 0x705   : > { %v4663_v16 = vadd.f32 %v6415_v38, %v2139_v5  ;;  %v2143_v5 = vld [vmem:[%s6822_s4 + $0x40] sm:$0xff] }
 0x708   : > { %v6503_v7 = vpop.f32.mrb[80].mxu1 }
 0x709   : > { %6878 = vst [vmem:[#allocation10_spill] sm:$0xff] %v6503_v7  ;;  %v6505_v9 = vpop.f32.mrb[81].mxu1 }
 0x70a   : > { %6879 = vst [vmem:[#allocation7_spill] sm:$0xff] %v6505_v9  ;;  %v2858_v11 = vpop.f32.mrb[82].mxu1 }
 0x70b   : > { %v2859_v13 = vpop.f32.mrb[83].mxu1 }
 0x710   : > { %v3486_v58 = vpop.f32.mrb[32].mxu0 }
 0x711   : > { %v4656_v60 = vadd.f32 %v4655_v17, %v3486_v58  ;;  %v3488_v57 = vpop.f32.mrb[33].mxu0  ;;  %v2142_v17 = vld [vmem:[%s6822_s4 + $0x38] sm:$0xff] }
 0x712   : > { %v4658_v28 = vadd.f32 %v4657_v19, %v3488_v57  ;;  %v3490_v11 = vpop.f32.mrb[34].mxu0  ;;  %v4667_v19 = vadd.f32 %v6419_v39, %v2141_v53 }
 0x713   : > { %v4334_v13 = vmul.f32 -1.442695, %v4656_v60  ;;  %v4660_v9 = vadd.f32 %v4659_v27, %v3490_v11  ;;  %v3492_v7 = vpop.f32.mrb[35].mxu0  ;;  %v4669_v27 = vadd.f32 %v6421_v41, %v2142_v17  ;;  %v2145_v41 = vld [vmem:[%s6822_s4 + $0x50] sm:$0xff] }
 0x714   : > { %v4335_v50 = vmul.f32 -1.442695, %v4658_v28  ;;  %v4662_v14 = vadd.f32 %v4661_v63, %v3492_v7  ;;  %v4665_v7 = vadd.f32 %v6417_v25, %v2140_v36  ;;  %v2144_v25 = vld [vmem:[%s6822_s4 + $0x48] sm:$0xff]  ;;  %v4671_v36 = vadd.f32 %v6423_v0, %v2143_v5 }
 0x715   : > { %5084 = vpow2.f32 %v4334_v13  ;;  %v4336_v32 = vmul.f32 -1.442695, %v4660_v9 }
 0x716   : > { %5086 = vpow2.f32 %v4335_v50  ;;  %v4337_v15 = vmul.f32 -1.442695, %v4662_v14 }
 0x717   : > { %5088 = vpow2.f32 %v4336_v32  ;;  %v2146_v32 = vld [vmem:[%s6822_s4 + $0x58] sm:$0xff] }
 0x718   : > { %5090 = vpow2.f32 %v4337_v15  ;;  %v3496_v18 = vpop.f32.mrb[36].mxu0  ;;  %v4673_v15 = vadd.f32 %v6425_v2, %v2144_v25  ;;  %v4677_v0 = vadd.f32 %v6429_v4, %v2146_v32  ;;  %v2148_v4 = vld [vmem:[%s6822_s4 + $0x68] sm:$0xff] }
 0x719   : > { %v4664_v9 = vadd.f32 %v4663_v16, %v3496_v18  ;;  %v3498_v58 = vpop.f32.mrb[37].mxu0  ;;  %v4675_v18 = vadd.f32 %v6427_v37, %v2145_v41  ;;  %v2147_v37 = vld [vmem:[%s6822_s4 + $0x60] sm:$0xff] }
 0x71a   : > { %v4666_v60 = vadd.f32 %v4665_v7, %v3498_v58  ;;  %v3500_v57 = vpop.f32.mrb[38].mxu0 }
 0x71b   : > { %v4338_v63 = vmul.f32 -1.442695, %v4664_v9  ;;  %v4668_v28 = vadd.f32 %v4667_v19, %v3500_v57  ;;  %v3502_v38 = vpop.f32.mrb[39].mxu0 }
 0x71c   : > { %v4339_v11 = vmul.f32 -1.442695, %v4666_v60  ;;  %v4670_v13 = vadd.f32 %v4669_v27, %v3502_v38 }
 0x71d   : > { %5092 = vpow2.f32 %v4338_v63  ;;  %v4340_v39 = vmul.f32 -1.442695, %v4668_v28 }
 0x71e   : > { %5094 = vpow2.f32 %v4339_v11  ;;  %v4341_v50 = vmul.f32 -1.442695, %v4670_v13 }
 0x71f   : > { %v5085_v14 = vpop.eup %5084  ;;  %5096 = vpow2.f32 %v4340_v39  ;;  %v2149_v39 = vld [vmem:[%s6822_s4 + $0x70] sm:$0xff] }
 0x720   : > { %v5087_v53 = vpop.eup %5086  ;;  %v3813_v16 = vadd.f32 1.0, %v5085_v14  ;;  %5098 = vpow2.f32 %v4341_v50  ;;  %v3506_v17 = vpop.f32.mrb[40].mxu0  ;;  %v4679_v14 = vadd.f32 %v6431_v6, %v2147_v37 }
 0x721   : > { %v5089_v7 = vpop.eup %5088  ;;  %v3814_v19 = vadd.f32 1.0, %v5087_v53  ;;  %v4672_v9 = vadd.f32 %v4671_v36, %v3506_v17  ;;  %v3508_v58 = vpop.f32.mrb[41].mxu0  ;;  %v2150_v36 = vld [vmem:[%s6822_s4 + $0x78] sm:$0xff]  ;;  %v4681_v53 = vadd.f32 %v6433_v40, %v2148_v4  ;;  %v2153_v4 = vld [vmem:[%s6822_s4 + $0x90] sm:$0xff] }
 0x722   : > { %v5091_v27 = vpop.eup %5090  ;;  %5100 = vrcp.f32 %v3813_v16  ;;  %v3815_v60 = vadd.f32 1.0, %v5089_v7  ;;  %v4674_v57 = vadd.f32 %v4673_v15, %v3508_v58  ;;  %v3510_v63 = vpop.f32.mrb[42].mxu0  ;;  %v4683_v7 = vadd.f32 %v6435_v8, %v2149_v39  ;;  %v2151_v8 = vld [vmem:[%s6822_s4 + $0x80] sm:$0xff] }
 0x723   : > { %5102 = vrcp.f32 %v3814_v19  ;;  %v3816_v2 = vadd.f32 1.0, %v5091_v27  ;;  %v4342_v28 = vmul.f32 -1.442695, %v4672_v9  ;;  %v4676_v38 = vadd.f32 %v4675_v18, %v3510_v63  ;;  %v3512_v5 = vpop.f32.mrb[43].mxu0 }
 0x724   : > { %5104 = vrcp.f32 %v3815_v60  ;;  %v4343_v11 = vmul.f32 -1.442695, %v4674_v57  ;;  %v4678_v13 = vadd.f32 %v4677_v0, %v3512_v5  ;;  %v4685_v6 = vadd.f32 %v6437_v10, %v2150_v36  ;;  %v2152_v10 = vld [vmem:[%s6822_s4 + $0x88] sm:$0xff] }
 0x725   : > { %5106 = vrcp.f32 %v3816_v2  ;;  %v4344_v25 = vmul.f32 -1.442695, %v4676_v38  ;;  %v4689_v36 = vadd.f32 %v6441_v12, %v2152_v10 }
 0x726   : > { %5108 = vpow2.f32 %v4342_v28  ;;  %v4345_v41 = vmul.f32 -1.442695, %v4678_v13 }
 0x727   : > { %v5093_v50 = vpop.eup %5092  ;;  %5110 = vpow2.f32 %v4343_v11 }
 0x728   : > { %v5095_v32 = vpop.eup %5094  ;;  %v3817_v15 = vadd.f32 1.0, %v5093_v50  ;;  %5112 = vpow2.f32 %v4344_v25  ;;  %v3516_v16 = vpop.f32.mrb[44].mxu0  ;;  %v2154_v50 = vld [vmem:[%s6822_s4 + $0x98] sm:$0xff] }
 0x729   : > { %v5097_v17 = vpop.eup %5096  ;;  %v3818_v18 = vadd.f32 1.0, %v5095_v32  ;;  %5114 = vpow2.f32 %v4345_v41  ;;  %v4680_v19 = vadd.f32 %v4679_v14, %v3516_v16  ;;  %v3518_v9 = vpop.f32.mrb[45].mxu0  ;;  %v4687_v41 = vadd.f32 %v6439_v1, %v2151_v8 }
 0x72a   : > { %v5099_v58 = vpop.eup %5098  ;;  %5116 = vrcp.f32 %v3817_v15  ;;  %v3819_v27 = vadd.f32 1.0, %v5097_v17  ;;  %v4682_v0 = vadd.f32 %v4681_v53, %v3518_v9  ;;  %v3520_v60 = vpop.f32.mrb[46].mxu0  ;;  %v4691_v15 = vadd.f32 %v6443_v20, %v2153_v4  ;;  %v2155_v20 = vld [vmem:[%s6822_s4 + $0xa0] sm:$0xff] }
 0x72b   : > { %5118 = vrcp.f32 %v3818_v18  ;;  %v3820_v40 = vadd.f32 1.0, %v5099_v58  ;;  %v4346_v57 = vmul.f32 -1.442695, %v4680_v19  ;;  %v4684_v63 = vadd.f32 %v4683_v7, %v3520_v60  ;;  %v3522_v2 = vpop.f32.mrb[47].mxu0 }
 0x72c   : > { %v5101_v28 = vpop.eup %5100  ;;  %5120 = vrcp.f32 %v3819_v27  ;;  %v4347_v38 = vmul.f32 -1.442695, %v4682_v0  ;;  %v4686_v5 = vadd.f32 %v4685_v6, %v3522_v2  ;;  %v4693_v18 = vadd.f32 %v6445_v21, %v2154_v50 }
 0x72d   : > { %v5103_v37 = vpop.eup %5102  ;;  %3963 = vst [vmem:[%s6579_s24] sm:$0xff] %v5101_v28  ;;  %5122 = vrcp.f32 %v3820_v40  ;;  %v4348_v11 = vmul.f32 -1.442695, %v4684_v63  ;;  %v2156_v28 = vld [vmem:[%s6822_s4 + $0xa8] sm:$0xff] }
 0x72e   : > { %v5105_v13 = vpop.eup %5104  ;;  %3964 = vst [vmem:[%s6579_s24 + $0x8] sm:$0xff] %v5103_v37  ;;  %5124 = vpow2.f32 %v4346_v57  ;;  %v4349_v25 = vmul.f32 -1.442695, %v4686_v5  ;;  %v2157_v5 = vld [vmem:[%s6822_s4 + $0xb0] sm:$0xff] }
 0x72f   : > { %v5107_v39 = vpop.eup %5106  ;;  %3965 = vst [vmem:[%s6579_s24 + $0x10] sm:$0xff] %v5105_v13  ;;  %5126 = vpow2.f32 %v4347_v38  ;;  %v2158_v13 = vld [vmem:[%s6822_s4 + $0xb8] sm:$0xff]  ;;  %v4699_v50 = vadd.f32 %v6451_v24, %v2157_v5  ;;  %v2159_v24 = vld [vmem:[%s6822_s4 + $0xc0] sm:$0xff] }
 0x730   : > { %v5109_v14 = vpop.eup %5108  ;;  %3966 = vst [vmem:[%s6579_s24 + $0x18] sm:$0xff] %v5107_v39  ;;  %5128 = vpow2.f32 %v4348_v11  ;;  %v3526_v32 = vpop.f32.mrb[48].mxu0  ;;  %v4695_v11 = vadd.f32 %v6447_v22, %v2155_v20 }
 0x731   : > { %v5111_v53 = vpop.eup %5110  ;;  %v3821_v16 = vadd.f32 1.0, %v5109_v14  ;;  %5130 = vpow2.f32 %v4349_v25  ;;  %v4688_v17 = vadd.f32 %v4687_v41, %v3526_v32  ;;  %v3528_v7 = vpop.f32.mrb[49].mxu0  ;;  %v4697_v25 = vadd.f32 %v6449_v23, %v2156_v28 }
 0x732   : > { %v5113_v1 = vpop.eup %5112  ;;  %v3822_v19 = vadd.f32 1.0, %v5111_v53  ;;  %v4690_v9 = vadd.f32 %v4689_v36, %v3528_v7  ;;  %v3530_v58 = vpop.f32.mrb[50].mxu0  ;;  %v4701_v53 = vadd.f32 %v6453_v43, %v2158_v13 }
 0x733   : > { %v5115_v6 = vpop.eup %5114  ;;  %5132 = vrcp.f32 %v3821_v16  ;;  %v3823_v12 = vadd.f32 1.0, %v5113_v1  ;;  %v4350_v27 = vmul.f32 -1.442695, %v4688_v17  ;;  %v4692_v0 = vadd.f32 %v4691_v15, %v3530_v58  ;;  %v3532_v60 = vpop.f32.mrb[51].mxu0 }
 0x734   : > { %v5117_v40 = vpop.eup %5116  ;;  %5134 = vrcp.f32 %v3822_v19  ;;  %v3824_v57 = vadd.f32 1.0, %v5115_v6  ;;  %v4351_v21 = vmul.f32 -1.442695, %v4690_v9  ;;  %v4694_v63 = vadd.f32 %v4693_v18, %v3532_v60  ;;  %v2161_v60 = vld [vmem:[%s6822_s4 + $0xd0] sm:$0xff] }
 0x735   : > { %v5119_v2 = vpop.eup %5118  ;;  %3967 = vst [vmem:[%s6579_s24 + $0x20] sm:$0xff] %v5117_v40  ;;  %5136 = vrcp.f32 %v3823_v12  ;;  %v4352_v8 = vmul.f32 -1.442695, %v4692_v0  ;;  %v2160_v12 = vld [vmem:[%s6822_s4 + $0xc8] sm:$0xff] }
 0x736   : > { %v5121_v38 = vpop.eup %5120  ;;  %3968 = vst [vmem:[%s6579_s24 + $0x28] sm:$0xff] %v5119_v2  ;;  %5138 = vrcp.f32 %v3824_v57  ;;  %v4353_v37 = vmul.f32 -1.442695, %v4694_v63  ;;  %v4703_v57 = vadd.f32 %v6455_v49, %v2159_v24  ;;  %v4705_v2 = vadd.f32 %v6457_v54, %v2160_v12 }
 0x737   : > { %v5123_v10 = vpop.eup %5122  ;;  %3969 = vst [vmem:[%s6579_s24 + $0x30] sm:$0xff] %v5121_v38  ;;  %5140 = vpow2.f32 %v4350_v27  ;;  %v4707_v38 = vadd.f32 %v6459_v42, %v2161_v60  ;;  %v2163_v42 = vld [vmem:[%s6822_s4 + $0xe0] sm:$0xff] }
 0x738   : > { %v5125_v4 = vpop.eup %5124  ;;  %3970 = vst [vmem:[%s6579_s24 + $0x38] sm:$0xff] %v5123_v10  ;;  %5142 = vpow2.f32 %v4351_v21  ;;  %v3536_v39 = vpop.f32.mrb[52].mxu0  ;;  %v2162_v21 = vld [vmem:[%s6822_s4 + $0xd8] sm:$0xff] }
 0x739   : > { %v5127_v41 = vpop.eup %5126  ;;  %v3825_v14 = vadd.f32 1.0, %v5125_v4  ;;  %5144 = vpow2.f32 %v4352_v8  ;;  %v4696_v36 = vadd.f32 %v4695_v11, %v3536_v39  ;;  %v3538_v32 = vpop.f32.mrb[53].mxu0  ;;  %v4709_v10 = vadd.f32 %v6461_v44, %v2162_v21 }
 0x73a   : > { %v5129_v22 = vpop.eup %5128  ;;  %v3826_v15 = vadd.f32 1.0, %v5127_v41  ;;  %5146 = vpow2.f32 %v4353_v37  ;;  %v4698_v16 = vadd.f32 %v4697_v25, %v3538_v32  ;;  %v3540_v17 = vpop.f32.mrb[54].mxu0 }
 0x73b   : > { %v5131_v7 = vpop.eup %5130  ;;  %5148 = vrcp.f32 %v3825_v14  ;;  %v3827_v23 = vadd.f32 1.0, %v5129_v22  ;;  %v4354_v1 = vmul.f32 -1.442695, %v4696_v36  ;;  %v4700_v18 = vadd.f32 %v4699_v50, %v3540_v17  ;;  %v3542_v19 = vpop.f32.mrb[55].mxu0  ;;  %v2164_v22 = vld [vmem:[%s6822_s4 + $0xe8] sm:$0xff]  ;;  %v2165_v17 = vld [vmem:[%s6822_s4 + $0xf0] sm:$0xff] }
 0x73c   : > { %5150 = vrcp.f32 %v3826_v15  ;;  %v3828_v9 = vadd.f32 1.0, %v5131_v7  ;;  %v4355_v58 = vmul.f32 -1.442695, %v4698_v16  ;;  %v4702_v43 = vadd.f32 %v4701_v53, %v3542_v19 }
 0x73d   : > { %v5133_v6 = vpop.eup %5132  ;;  %5152 = vrcp.f32 %v3827_v23  ;;  %v4356_v27 = vmul.f32 -1.442695, %v4700_v18  ;;  %v2166_v18 = vld [vmem:[%s6822_s4 + $0xf8] sm:$0xff] }
 0x73e   : > { %v5135_v0 = vpop.eup %5134  ;;  %3971 = vst [vmem:[%s6579_s24 + $0x40] sm:$0xff] %v5133_v6  ;;  %5154 = vrcp.f32 %v3828_v9  ;;  %v4357_v40 = vmul.f32 -1.442695, %v4702_v43  ;;  %v4713_v9 = vadd.f32 %v6465_v33, %v2164_v22  ;;  %v4715_v6 = vadd.f32 %v6467_v34, %v2165_v17  ;;  %v2167_v34 = vld [vmem:[%s6822_s4 + $0x100] sm:$0xff] }
 0x73f   : > { %v5137_v20 = vpop.eup %5136  ;;  %3972 = vst [vmem:[%s6579_s24 + $0x48] sm:$0xff] %v5135_v0  ;;  %5156 = vpow2.f32 %v4354_v1  ;;  %v4711_v1 = vadd.f32 %v6463_v56, %v2163_v42  ;;  %v4717_v0 = vadd.f32 %v6469_v62, %v2166_v18  ;;  %v2168_v62 = vld [vmem:[%s6822_s4 + $0x108] sm:$0xff] }
 0x740   : > { %v5139_v63 = vpop.eup %5138  ;;  %3973 = vst [vmem:[%s6579_s24 + $0x50] sm:$0xff] %v5137_v20  ;;  %5158 = vpow2.f32 %v4355_v58  ;;  %v3546_v28 = vpop.f32.mrb[56].mxu0 }
 0x741   : > { %v5141_v8 = vpop.eup %5140  ;;  %3974 = vst [vmem:[%s6579_s24 + $0x58] sm:$0xff] %v5139_v63  ;;  %5160 = vpow2.f32 %v4356_v27  ;;  %v4704_v5 = vadd.f32 %v4703_v57, %v3546_v28  ;;  %v3548_v37 = vpop.f32.mrb[57].mxu0 }
 0x742   : > { %v5143_v49 = vpop.eup %5142  ;;  %v3829_v11 = vadd.f32 1.0, %v5141_v8  ;;  %5162 = vpow2.f32 %v4357_v40  ;;  %v4706_v13 = vadd.f32 %v4705_v2, %v3548_v37  ;;  %v3550_v4 = vpop.f32.mrb[58].mxu0 }
 0x743   : > { %v5145_v25 = vpop.eup %5144  ;;  %v3830_v39 = vadd.f32 1.0, %v5143_v49  ;;  %v4708_v54 = vadd.f32 %v4707_v38, %v3550_v4  ;;  %v3552_v41 = vpop.f32.mrb[59].mxu0  ;;  %v4358_v36 = vmul.f32 -1.442695, %v4704_v5  ;;  %v4719_v4 = vadd.f32 %v6471_v61, %v2167_v34 }
 0x744   : > { %v5147_v50 = vpop.eup %5146  ;;  %5164 = vrcp.f32 %v3829_v11  ;;  %v3831_v14 = vadd.f32 1.0, %v5145_v25  ;;  %v4710_v32 = vadd.f32 %v4709_v10, %v3552_v41  ;;  %v4359_v15 = vmul.f32 -1.442695, %v4706_v13  ;;  %v2169_v10 = vld [vmem:[%s6822_s4 + $0x110] sm:$0xff]  ;;  %v2170_v25 = vld [vmem:[%s6822_s4 + $0x118] sm:$0xff] }
 0x745   : > { %v5149_v44 = vpop.eup %5148  ;;  %5166 = vrcp.f32 %v3830_v39  ;;  %v3832_v53 = vadd.f32 1.0, %v5147_v50  ;;  %v4360_v7 = vmul.f32 -1.442695, %v4708_v54  ;;  %v4721_v41 = vadd.f32 %v6473_v59, %v2168_v62 }
 0x746   : > { %v5151_v16 = vpop.eup %5150  ;;  %3975 = vst [vmem:[%s6579_s24 + $0x60] sm:$0xff] %v5149_v44  ;;  %5168 = vrcp.f32 %v3831_v14  ;;  %v4361_v19 = vmul.f32 -1.442695, %v4710_v32  ;;  %v4723_v14 = vadd.f32 %v6475_v3, %v2169_v10  ;;  %v4725_v44 = vadd.f32 %v6477_v30, %v2170_v25  ;;  %v2171_v3 = vld [vmem:[%s6822_s4 + $0x120] sm:$0xff]  ;;  %v2172_v30 = vld [vmem:[%s6822_s4 + $0x128] sm:$0xff]  ;;  %v2177_v25 = vld [vmem:[%s6822_s4 + $0x150] sm:$0xff] }
 0x747   : > { %v5153_v23 = vpop.eup %5152  ;;  %3976 = vst [vmem:[%s6579_s24 + $0x68] sm:$0xff] %v5151_v16  ;;  %5170 = vrcp.f32 %v3832_v53 }
 0x748   : > { %v5155_v24 = vpop.eup %5154  ;;  %3977 = vst [vmem:[%s6579_s24 + $0x70] sm:$0xff] %v5153_v23  ;;  %5172 = vpow2.f32 %v4358_v36  ;;  %v3556_v58 = vpop.f32.mrb[60].mxu0 }
 0x749   : > { %v5157_v43 = vpop.eup %5156  ;;  %3978 = vst [vmem:[%s6579_s24 + $0x78] sm:$0xff] %v5155_v24  ;;  %5174 = vpow2.f32 %v4359_v15  ;;  %v4712_v12 = vadd.f32 %v4711_v1, %v3556_v58  ;;  %v3558_v56 = vpop.f32.mrb[61].mxu0  ;;  %v2173_v58 = vld [vmem:[%s6822_s4 + $0x130] sm:$0xff] }
 0x74a   : > { %v5159_v27 = vpop.eup %5158  ;;  %v3833_v60 = vadd.f32 1.0, %v5157_v43  ;;  %5176 = vpow2.f32 %v4360_v7  ;;  %v4714_v40 = vadd.f32 %v4713_v9, %v3558_v56  ;;  %v3560_v20 = vpop.f32.mrb[62].mxu0  ;;  %v4727_v56 = vadd.f32 %v6479_v26, %v2171_v3 }
 0x74b   : > { %v5161_v57 = vpop.eup %5160  ;;  %v3834_v21 = vadd.f32 1.0, %v5159_v27  ;;  %5178 = vpow2.f32 %v4361_v19  ;;  %v4716_v33 = vadd.f32 %v4715_v6, %v3560_v20  ;;  %v3562_v63 = vpop.f32.mrb[63].mxu0  ;;  %v4362_v8 = vmul.f32 -1.442695, %v4712_v12  ;;  %v2174_v27 = vld [vmem:[%s6822_s4 + $0x138] sm:$0xff] }
 0x74c   : > { %v5163_v2 = vpop.eup %5162  ;;  %5180 = vrcp.f32 %v3833_v60  ;;  %v3835_v28 = vadd.f32 1.0, %v5161_v57  ;;  %v4718_v38 = vadd.f32 %v4717_v0, %v3562_v63  ;;  %v4363_v37 = vmul.f32 -1.442695, %v4714_v40 }
 0x74d   : > { %5182 = vrcp.f32 %v3834_v21  ;;  %v3836_v5 = vadd.f32 1.0, %v5163_v2  ;;  %v4364_v11 = vmul.f32 -1.442695, %v4716_v33  ;;  %v4729_v40 = vadd.f32 %v6481_v29, %v2172_v30 }
 0x74e   : > { %v5165_v49 = vpop.eup %5164  ;;  %5184 = vrcp.f32 %v3835_v28  ;;  %v4365_v39 = vmul.f32 -1.442695, %v4718_v38  ;;  %v4731_v33 = vadd.f32 %v6483_v31, %v2173_v58  ;;  %v4733_v34 = vadd.f32 %v6485_v35, %v2174_v27  ;;  %v2175_v31 = vld [vmem:[%s6822_s4 + $0x140] sm:$0xff]  ;;  %v2176_v35 = vld [vmem:[%s6822_s4 + $0x148] sm:$0xff] }
 0x74f   : > { %v5167_v13 = vpop.eup %5166  ;;  %3979 = vst [vmem:[%s6579_s24 + $0x80] sm:$0xff] %v5165_v49  ;;  %5186 = vrcp.f32 %v3836_v5 }
 0x750   : > { %v5169_v54 = vpop.eup %5168  ;;  %3980 = vst [vmem:[%s6579_s24 + $0x88] sm:$0xff] %v5167_v13  ;;  %5188 = vpow2.f32 %v4362_v8  ;;  %v3566_v50 = vpop.f32.mrb[64].mxu0 }
 0x751   : > { %v5171_v42 = vpop.eup %5170  ;;  %3981 = vst [vmem:[%s6579_s24 + $0x90] sm:$0xff] %v5169_v54  ;;  %5190 = vpow2.f32 %v4363_v37  ;;  %v4720_v61 = vadd.f32 %v4719_v4, %v3566_v50  ;;  %v3568_v36 = vpop.f32.mrb[65].mxu0  ;;  %v4735_v50 = vadd.f32 %v6487_v45, %v2175_v31 }
 0x752   : > { %v5173_v32 = vpop.eup %5172  ;;  %3982 = vst [vmem:[%s6579_s24 + $0x98] sm:$0xff] %v5171_v42  ;;  %5192 = vpow2.f32 %v4364_v11  ;;  %v4722_v22 = vadd.f32 %v4721_v41, %v3568_v36  ;;  %v3570_v53 = vpop.f32.mrb[66].mxu0  ;;  %v2178_v42 = vld [vmem:[%s6822_s4 + $0x158] sm:$0xff]  ;;  %v4737_v36 = vadd.f32 %v6489_v46, %v2176_v35  ;;  %v2184_v35 = vld [vmem:[%s6822_s4 + $0x188] sm:$0xff] }
 0x753   : > { %v5175_v15 = vpop.eup %5174  ;;  %v3837_v16 = vadd.f32 1.0, %v5173_v32  ;;  %5194 = vpow2.f32 %v4365_v39  ;;  %v4724_v59 = vadd.f32 %v4723_v14, %v3570_v53  ;;  %v3572_v17 = vpop.f32.mrb[67].mxu0  ;;  %v4366_v24 = vmul.f32 -1.442695, %v4720_v61 }
 0x754   : > { %v5177_v7 = vpop.eup %5176  ;;  %v3838_v23 = vadd.f32 1.0, %v5175_v15  ;;  %v4726_v1 = vadd.f32 %v4725_v44, %v3572_v17  ;;  %v4367_v6 = vmul.f32 -1.442695, %v4722_v22  ;;  %v4739_v53 = vadd.f32 %v6491_v47, %v2177_v25  ;;  %v2179_v47 = vld [vmem:[%s6822_s4 + $0x160] sm:$0xff] }
 0x755   : > { %v5179_v18 = vpop.eup %5178  ;;  %5196 = vrcp.f32 %v3837_v16  ;;  %v3839_v19 = vadd.f32 1.0, %v5177_v7  ;;  %v4368_v0 = vmul.f32 -1.442695, %v4724_v59  ;;  %v4741_v59 = vadd.f32 %v6493_v48, %v2178_v42  ;;  %v2180_v48 = vld [vmem:[%s6822_s4 + $0x168] sm:$0xff] }
 0x756   : > { %v5181_v9 = vpop.eup %5180  ;;  %5198 = vrcp.f32 %v3838_v23  ;;  %v3840_v43 = vadd.f32 1.0, %v5179_v18  ;;  %v4369_v20 = vmul.f32 -1.442695, %v4726_v1  ;;  %v4743_v27 = vadd.f32 %v6495_v51, %v2179_v47 }
 0x757   : > { %v5183_v12 = vpop.eup %5182  ;;  %3983 = vst [vmem:[%s6579_s24 + $0xa0] sm:$0xff] %v5181_v9  ;;  %5200 = vrcp.f32 %v3839_v19 }
 0x758   : > { %v5185_v60 = vpop.eup %5184  ;;  %3984 = vst [vmem:[%s6579_s24 + $0xa8] sm:$0xff] %v5183_v12  ;;  %5202 = vrcp.f32 %v3840_v43  ;;  %v3576_v57 = vpop.f32.mrb[68].mxu0  ;;  %v2181_v43 = vld [vmem:[%s6822_s4 + $0x170] sm:$0xff] }
 0x759   : > { %v5187_v21 = vpop.eup %5186  ;;  %3985 = vst [vmem:[%s6579_s24 + $0xb0] sm:$0xff] %v5185_v60  ;;  %5204 = vpow2.f32 %v4366_v24  ;;  %v4728_v26 = vadd.f32 %v4727_v56, %v3576_v57  ;;  %v3578_v63 = vpop.f32.mrb[69].mxu0  ;;  %v4745_v57 = vadd.f32 %v6497_v52, %v2180_v48 }
 0x75a   : > { %v5189_v2 = vpop.eup %5188  ;;  %3986 = vst [vmem:[%s6579_s24 + $0xb8] sm:$0xff] %v5187_v21  ;;  %5206 = vpow2.f32 %v4367_v6  ;;  %v4730_v28 = vadd.f32 %v4729_v40, %v3578_v63  ;;  %v3580_v8 = vpop.f32.mrb[70].mxu0  ;;  %v4747_v63 = vadd.f32 %v6499_v55, %v2181_v43  ;;  %v2183_v55 = vld [vmem:[%s6822_s4 + $0x180] sm:$0xff] }
 0x75b   : > { %v5191_v38 = vpop.eup %5190  ;;  %v3841_v29 = vadd.f32 1.0, %v5189_v2  ;;  %5208 = vpow2.f32 %v4368_v0  ;;  %v4732_v62 = vadd.f32 %v4731_v33, %v3580_v8  ;;  %v3582_v5 = vpop.f32.mrb[71].mxu0  ;;  %v4370_v4 = vmul.f32 -1.442695, %v4728_v26  ;;  %v2182_v0 = vld [vmem:[%s6822_s4 + $0x178] sm:$0xff] }
 0x75c   : > { %v5193_v37 = vpop.eup %5192  ;;  %v3842_v49 = vadd.f32 1.0, %v5191_v38  ;;  %5210 = vpow2.f32 %v4369_v20  ;;  %v4734_v10 = vadd.f32 %v4733_v34, %v3582_v5  ;;  %v4371_v54 = vmul.f32 -1.442695, %v4730_v28  ;;  %v6880_v28 = vld [vmem:[#allocation6_spill] sm:$0xff] }
 0x75d   : > { %v5195_v11 = vpop.eup %5194  ;;  %5212 = vrcp.f32 %v3841_v29  ;;  %v3843_v13 = vadd.f32 1.0, %v5193_v37  ;;  %v4372_v14 = vmul.f32 -1.442695, %v4732_v62  ;;  %v4749_v8 = vadd.f32 %v6880_v28, %v2182_v0 }
 0x75e   : > { %5214 = vrcp.f32 %v3842_v49  ;;  %v3844_v39 = vadd.f32 1.0, %v5195_v11  ;;  %v4373_v32 = vmul.f32 -1.442695, %v4734_v10 }
 0x75f   : > { %v5197_v41 = vpop.eup %5196  ;;  %5216 = vrcp.f32 %v3843_v13 }
 0x760   : > { %v5199_v61 = vpop.eup %5198  ;;  %3987 = vst [vmem:[%s6579_s24 + $0xc0] sm:$0xff] %v5197_v41  ;;  %5218 = vrcp.f32 %v3844_v39  ;;  %v3586_v44 = vpop.f32.mrb[72].mxu0 }
 0x761   : > { %v5201_v22 = vpop.eup %5200  ;;  %3988 = vst [vmem:[%s6579_s24 + $0xc8] sm:$0xff] %v5199_v61  ;;  %5220 = vpow2.f32 %v4370_v4  ;;  %v4736_v45 = vadd.f32 %v4735_v50, %v3586_v44  ;;  %v3588_v15 = vpop.f32.mrb[73].mxu0  ;;  %v6882_v61 = vld [vmem:[#allocation7_spill] sm:$0xff] }
 0x762   : > { %v5203_v16 = vpop.eup %5202  ;;  %3989 = vst [vmem:[%s6579_s24 + $0xd0] sm:$0xff] %v5201_v22  ;;  %5222 = vpow2.f32 %v4371_v54  ;;  %v4738_v17 = vadd.f32 %v4737_v36, %v3588_v15  ;;  %v3590_v7 = vpop.f32.mrb[74].mxu0  ;;  %v6881_v54 = vld [vmem:[#allocation10_spill] sm:$0xff]  ;;  %v4753_v36 = vadd.f32 %v6882_v61, %v2184_v35 }
 0x763   : > { %v5205_v46 = vpop.eup %5204  ;;  %3990 = vst [vmem:[%s6579_s24 + $0xd8] sm:$0xff] %v5203_v16  ;;  %5224 = vpow2.f32 %v4372_v14  ;;  %v4374_v3 = vmul.f32 -1.442695, %v4736_v45  ;;  %v4740_v23 = vadd.f32 %v4739_v53, %v3590_v7  ;;  %v3592_v1 = vpop.f32.mrb[75].mxu0  ;;  %v4751_v41 = vadd.f32 %v6881_v54, %v2183_v55 }
 0x764   : > { %v5207_v18 = vpop.eup %5206  ;;  %v3845_v30 = vadd.f32 1.0, %v5205_v46  ;;  %5226 = vpow2.f32 %v4373_v32  ;;  %v4742_v19 = vadd.f32 %v4741_v59, %v3592_v1  ;;  %v4375_v12 = vmul.f32 -1.442695, %v4738_v17 }
 0x765   : > { %v5209_v24 = vpop.eup %5208  ;;  %v3846_v9 = vadd.f32 1.0, %v5207_v18  ;;  %5228 = vpow2.f32 %v4374_v3  ;;  %v4376_v40 = vmul.f32 -1.442695, %v4740_v23 }
 0x766   : > { %v5211_v58 = vpop.eup %5210  ;;  %5230 = vrcp.f32 %v3845_v30  ;;  %v3847_v6 = vadd.f32 1.0, %v5209_v24  ;;  %v4377_v21 = vmul.f32 -1.442695, %v4742_v19 }
 0x767   : > { %v5213_v56 = vpop.eup %5212  ;;  %5232 = vrcp.f32 %v3846_v9  ;;  %v3848_v60 = vadd.f32 1.0, %v5211_v58 }
 0x768   : > { %v5215_v20 = vpop.eup %5214  ;;  %3991 = vst [vmem:[%s6579_s24 + $0xe0] sm:$0xff] %v5213_v56  ;;  %5234 = vrcp.f32 %v3847_v6  ;;  %v3596_v33 = vpop.f32.mrb[76].mxu0 }
 0x769   : > { %v5217_v26 = vpop.eup %5216  ;;  %3992 = vst [vmem:[%s6579_s24 + $0xe8] sm:$0xff] %v5215_v20  ;;  %5236 = vrcp.f32 %v3848_v60  ;;  %v4744_v51 = vadd.f32 %v4743_v27, %v3596_v33  ;;  %v3598_v2 = vpop.f32.mrb[77].mxu0 }
 0x76a   : > { %v5219_v34 = vpop.eup %5218  ;;  %3993 = vst [vmem:[%s6579_s24 + $0xf0] sm:$0xff] %v5217_v26  ;;  %5238 = vpow2.f32 %v4375_v12  ;;  %v4746_v38 = vadd.f32 %v4745_v57, %v3598_v2  ;;  %v3600_v29 = vpop.f32.mrb[78].mxu0 }
 0x76b   : > { %v5221_v52 = vpop.eup %5220  ;;  %3994 = vst [vmem:[%s6579_s24 + $0xf8] sm:$0xff] %v5219_v34  ;;  %5240 = vpow2.f32 %v4376_v40  ;;  %v4378_v62 = vmul.f32 -1.442695, %v4744_v51  ;;  %v4748_v5 = vadd.f32 %v4747_v63, %v3600_v29  ;;  %v3602_v37 = vpop.f32.mrb[79].mxu0 }
 0x76c   : > { %v5223_v31 = vpop.eup %5222  ;;  %v3849_v49 = vadd.f32 1.0, %v5221_v52  ;;  %5242 = vpow2.f32 %v4377_v21  ;;  %v4750_v10 = vadd.f32 %v4749_v8, %v3602_v37  ;;  %v4379_v42 = vmul.f32 -1.442695, %v4746_v38 }
 0x76d   : > { %v5225_v11 = vpop.eup %5224  ;;  %v3850_v13 = vadd.f32 1.0, %v5223_v31  ;;  %5244 = vpow2.f32 %v4378_v62  ;;  %v4380_v44 = vmul.f32 -1.442695, %v4748_v5 }
 0x76e   : > { %v5227_v4 = vpop.eup %5226  ;;  %5246 = vrcp.f32 %v3849_v49  ;;  %v3851_v25 = vadd.f32 1.0, %v5225_v11  ;;  %v4381_v45 = vmul.f32 -1.442695, %v4750_v10 }
 0x76f   : > { %v5229_v39 = vpop.eup %5228  ;;  %5248 = vrcp.f32 %v3850_v13  ;;  %v3852_v50 = vadd.f32 1.0, %v5227_v4 }
 0x770   : > { %v5231_v14 = vpop.eup %5230  ;;  %5250 = vrcp.f32 %v3851_v25  ;;  %v3853_v32 = vadd.f32 1.0, %v5229_v39  ;;  %v3606_v22 = vpop.f32.mrb[80].mxu0 }
 0x771   : > { %v5233_v53 = vpop.eup %5232  ;;  %3995 = vst [vmem:[%s6579_s24 + $0x100] sm:$0xff] %v5231_v14  ;;  %5252 = vrcp.f32 %v3852_v50  ;;  %v4752_v15 = vadd.f32 %v4751_v41, %v3606_v22  ;;  %v3608_v16 = vpop.f32.mrb[81].mxu0 }
 0x772   : > { %v5235_v59 = vpop.eup %5234  ;;  %3996 = vst [vmem:[%s6579_s24 + $0x108] sm:$0xff] %v5233_v53  ;;  %5254 = vrcp.f32 %v3853_v32  ;;  %v4754_v17 = vadd.f32 %v4753_v36, %v3608_v16  ;;  %v3610_v7 = vpop.f32.mrb[82].mxu0 }
 0x773   : > { %v5237_v46 = vpop.eup %5236  ;;  %3997 = vst [vmem:[%s6579_s24 + $0x110] sm:$0xff] %v5235_v59  ;;  %5256 = vpow2.f32 %v4379_v42  ;;  %v4382_v3 = vmul.f32 -1.442695, %v4752_v15  ;;  %v3611_v23 = vpop.f32.mrb[83].mxu0 }
 0x774   : > { %v5239_v1 = vpop.eup %5238  ;;  %3998 = vst [vmem:[%s6579_s24 + $0x118] sm:$0xff] %v5237_v46  ;;  %5258 = vpow2.f32 %v4380_v44  ;;  %v4383_v9 = vmul.f32 -1.442695, %v4754_v17 }
 0x775   : > { %v5241_v18 = vpop.eup %5240  ;;  %v3854_v47 = vadd.f32 1.0, %v5239_v1  ;;  %5260 = vpow2.f32 %v4381_v45 }
 0x776   : > { %v5243_v30 = vpop.eup %5242  ;;  %v3855_v19 = vadd.f32 1.0, %v5241_v18  ;;  %5262 = vpow2.f32 %v4382_v3 }
 0x777   : > { %v5245_v24 = vpop.eup %5244  ;;  %5264 = vrcp.f32 %v3854_v47  ;;  %v3856_v48 = vadd.f32 1.0, %v5243_v30 }
 0x778   : > { %v5247_v58 = vpop.eup %5246  ;;  %5266 = vrcp.f32 %v3855_v19  ;;  %v3857_v43 = vadd.f32 1.0, %v5245_v24 }
 0x779   : > { %v5249_v6 = vpop.eup %5248  ;;  %3999 = vst [vmem:[%s6579_s24 + $0x120] sm:$0xff] %v5247_v58  ;;  %5268 = vrcp.f32 %v3856_v48 }
 0x77a   : > { %v5251_v12 = vpop.eup %5250  ;;  %4000 = vst [vmem:[%s6579_s24 + $0x128] sm:$0xff] %v5249_v6  ;;  %5270 = vrcp.f32 %v3857_v43 }
 0x77b   : > { %v5253_v56 = vpop.eup %5252  ;;  %4001 = vst [vmem:[%s6579_s24 + $0x130] sm:$0xff] %v5251_v12  ;;  %5272 = vpow2.f32 %v4383_v9 }
 0x77c   : > { %v5255_v27 = vpop.eup %5254  ;;  %4002 = vst [vmem:[%s6579_s24 + $0x138] sm:$0xff] %v5253_v56 }
 0x77d   : > { %v5257_v0 = vpop.eup %5256  ;;  %4003 = vst [vmem:[%s6579_s24 + $0x140] sm:$0xff] %v5255_v27 }
 0x77e   : > { %v5259_v60 = vpop.eup %5258  ;;  %v3858_v40 = vadd.f32 1.0, %v5257_v0 }
 0x77f   : > { %v5261_v20 = vpop.eup %5260  ;;  %v3859_v57 = vadd.f32 1.0, %v5259_v60 }
 0x780   : > { %v5263_v21 = vpop.eup %5262  ;;  %5274 = vrcp.f32 %v3858_v40  ;;  %v3860_v33 = vadd.f32 1.0, %v5261_v20 }
 0x781   : > { %v5265_v26 = vpop.eup %5264  ;;  %5276 = vrcp.f32 %v3859_v57  ;;  %v3861_v63 = vadd.f32 1.0, %v5263_v21 }
 0x782   : > { %v5267_v51 = vpop.eup %5266  ;;  %4004 = vst [vmem:[%s6579_s24 + $0x148] sm:$0xff] %v5265_v26  ;;  %5278 = vrcp.f32 %v3860_v33 }
 0x783   : > { %v5269_v2 = vpop.eup %5268  ;;  %4005 = vst [vmem:[%s6579_s24 + $0x150] sm:$0xff] %v5267_v51  ;;  %5280 = vrcp.f32 %v3861_v63 }
 0x784   : > { %v5271_v34 = vpop.eup %5270  ;;  %4006 = vst [vmem:[%s6579_s24 + $0x158] sm:$0xff] %v5269_v2 }
 0x785   : > { %v5273_v28 = vpop.eup %5272  ;;  %4007 = vst [vmem:[%s6579_s24 + $0x160] sm:$0xff] %v5271_v34 }
 0x786   : > { %v3862_v8 = vadd.f32 1.0, %v5273_v28 }
 0x788   : > { %5282 = vrcp.f32 %v3862_v8 }
 0x78a   : > { %v5275_v38 = vpop.eup %5274 }
 0x78b   : > { %v5277_v29 = vpop.eup %5276  ;;  %4008 = vst [vmem:[%s6579_s24 + $0x168] sm:$0xff] %v5275_v38 }
 0x78c   : > { %v5279_v52 = vpop.eup %5278  ;;  %4009 = vst [vmem:[%s6579_s24 + $0x170] sm:$0xff] %v5277_v29 }
 0x78d   : > { %v5281_v62 = vpop.eup %5280  ;;  %4010 = vst [vmem:[%s6579_s24 + $0x178] sm:$0xff] %v5279_v52 }
 0x78e   : > { %4011 = vst [vmem:[%s6579_s24 + $0x180] sm:$0xff] %v5281_v62 }
 0x792   : > { %v5283_v5 = vpop.eup %5282 }
 0x793   : > { %4012 = vst [vmem:[%s6579_s24 + $0x188] sm:$0xff] %v5283_v5 }
 0x794   : > { %5322 = shalt.err (!%p5319_p5)
}
 0x795   : > { %s5323_s25 = scalar_lea.hbm %s6765_s12, 6400  ;;  %s5327_s14 = scalar_lea.hbm %s6823_s5, 12800 }
 0x796   : > { %p5324_p6 = scmp.ne.s32.totalorder %s6765_s12, %s5323_s25  ;;  %p5328_p10 = scmp.lt.u32.totalorder %s6765_s12, %s6823_s5 }
 0x797   : > { %p5329_p11 = scmp.lt.u32.totalorder %s5327_s14, %s5323_s25  ;;  %p5331_p13 = scmp.lt.u32.totalorder %s5323_s25, %s6765_s12 }
 0x798   : > { %p5325_p7 = pnand %p5324_p6, %p5467_p4 }
 0x799   : > { %p5330_p12 = por %p5329_p11, %p5328_p10 }
 0x79a   : > { %p5326_p9 = pneg %p5325_p7 }
 0x79b   : > { %p5332_p0 = por %p5331_p13, %p5330_p12 }
 0x79d   : > { %p5333_p1 = pnand %p5332_p0, %p5326_p9 }
 0x79f   : > { %5336 = shalt.err (!%p5333_p1)
}
 0x7a0   : > { %s5395_s17 = smov 256   ;;  %s5396_s9 = smov 16  }
 0x7a1   : > { %4910 = dma.vmem_to_hbm [thread:$0]  (%p5467_p4), %s6767_s27, 6400, %s6765_s12, %s6772_s11, %s5395_s17, %s5395_s17, %s5396_s9  }
 0x7a2 PF: > { %p4916_p2 = scmp.ge.s32.totalorder %s5387_s23, 2  ;;  %s4042_s10 = sand.u32 1, %s5367_s18  }
 0x7a3   : > { %s4043_s21 = scalar_lea.sflag [#allocation4], %s4042_s10 }
 0x7a4   : > { %p4913_p3 = pnand %p4916_p2, %p5474_p8 }
 0x7a6   : > { %5362 = dma.done.wait (!%p4913_p3), %s4043_s21, 6400  }
 0x7a7   : > { %5364 = vsyncadd (!%p4913_p3), %s4043_s21, 4294960896  ;;  %s18_s23 = sadd.s32 1, %s5387_s23   ;;  %s6883_s18 = smov %s5371_s19 }
 0x7a8   : > { %p15_p5 = scmp.ge.s32.totalorder %s18_s23, 4   ;;  %s6884_s19 = smov %s5375_s20 }
 0x7a9   : > { %s6885_s20 = smov %s5480_s6  ;;  %s6886_s21 = smov %s5383_s22 }
 0x7aa   : > { %s6887_s22 = smov %s6889_s26  ;;  %17 = sbr.rel (!%p15_p5) target bundleno = 4 (0x4), region = 92 }
 0x7b1   :  { %4048 = vsyncpa [#allocation4], 1 }
 0x7b2   :  { %4050 = vsyncpa [#allocation4 + $0x1], 1 }

</bundles_post_ra>
